<compile_context>
chip_gen: v6e
topology: v6e:2x2x1
jax: 0.10.0
libtpu: 0.0.40
codegen_flags: <defaults>
</compile_context>

<pallas_src>
import functools

import jax
import jax.numpy as jnp
from jax.experimental import pallas as pl
from jax.experimental.pallas import tpu as pltpu


def _round_up(x, m):
    return ((x + m - 1) // m) * m


def _conv_bn_relu_kernel(x_ref, w_ref, b_ref, o_ref, *, kh, kw, w_pad, m_pad, tn):
    # x_ref: (1, R, Cin)          flattened, spatially padded NHWC image (one batch element)
    # w_ref: (kh*kw, Cin, tn)     BN-scale-folded weights, one (Cin, tn) slab per tap
    # b_ref: (1, tn)              folded BN bias (f32)
    # o_ref: (1, m_pad, tn)       dense (stride-1) conv rows, lane-dense channel tile
    acc = jnp.broadcast_to(b_ref[...].astype(jnp.float32), (m_pad, tn))
    for i in range(kh):
        for j in range(kw):
            off = i * w_pad + j                     # static tap offset into the flat rows
            lhs = x_ref[0, off:off + m_pad, :]      # (m_pad, Cin) implicit-im2col view
            acc = acc + jnp.dot(lhs, w_ref[i * kw + j],
                                preferred_element_type=jnp.float32)
    o_ref[0] = jnp.maximum(acc, 0.0).astype(o_ref.dtype)


@functools.partial(jax.jit, static_argnames=("stride", "padding", "eps", "compute_dtype"))
def basic_conv2d_forward(x_nchw, weight, gamma, beta, running_mean, running_var,
                         *, stride=1, padding=0, eps=1e-3, compute_dtype=None):
    """Equivalent of BasicConv2d.forward (eval-mode BN). x_nchw: (N, Cin, H, W).

    compute_dtype: optionally cast matmul operands (e.g. jnp.bfloat16 on v6e/v7x);
    accumulation stays in float32 and the output keeps x's dtype.
    """
    Cout, Cin, kh, kw = weight.shape
    N, _, H, W = x_nchw.shape
    out_dtype = x_nchw.dtype

    H_pad, W_pad = H + 2 * padding, W + 2 * padding
    OH = (H_pad - kh) // stride + 1
    OW = (W_pad - kw) // stride + 1
    OH_d = H_pad - kh + 1                    # dense (stride-1) output rows the kernel computes
    M_out = OH_d * W_pad                     # dense flat output rows per image (incl. wrap cols)
    M_pad = _round_up(M_out, 8)              # sublane-aligned output rows
    R = M_pad + (kh - 1) * W_pad + (kw - 1)  # flat input rows incl. slack so every tap stays in-bounds
    Cout_p = _round_up(Cout, 128)            # lane-dense output channels

    # Cout tile: full width if small, else the largest lane-multiple divisor <= 512.
    if Cout_p <= 512:
        TN = Cout_p
    else:
        TN = next(t for t in (512, 384, 256, 128) if Cout_p % t == 0)
    n_co = Cout_p // TN

    # ---- glue (plain JAX, no im2col blow-up): NCHW -> NHWC, spatial pad, flatten rows ----
    x = jnp.transpose(x_nchw, (0, 2, 3, 1))
    x = jnp.pad(x, ((0, 0), (padding, padding), (padding, padding), (0, 0)))
    x = x.reshape(N, H_pad * W_pad, Cin)
    tail = R - H_pad * W_pad
    if tail > 0:
        x = jnp.pad(x, ((0, 0), (0, tail), (0, 0)))

    # ---- fold eval-mode BN into per-channel scale/bias; fold the scale into the weights ----
    inv_std = jax.lax.rsqrt(running_var.astype(jnp.float32) + eps)
    scale = gamma.astype(jnp.float32) * inv_std
    bias = beta.astype(jnp.float32) - running_mean.astype(jnp.float32) * scale

    # weight (Cout, Cin, kh, kw) -> (kh, kw, Cin, Cout) -> (kh*kw, Cin, Cout_p), scale folded in.
    w = jnp.transpose(weight, (2, 3, 1, 0)).reshape(kh * kw, Cin, Cout)
    w = w.astype(jnp.float32) * scale[None, None, :]
    w = jnp.pad(w, ((0, 0), (0, 0), (0, Cout_p - Cout)))
    bias = jnp.pad(bias, (0, Cout_p - Cout)).reshape(1, Cout_p)

    if compute_dtype is not None:
        x = x.astype(compute_dtype)
        w = w.astype(compute_dtype)

    kernel = functools.partial(_conv_bn_relu_kernel, kh=kh, kw=kw, w_pad=W_pad,
                               m_pad=M_pad, tn=TN)

    flops = 2 * N * M_pad * (kh * kw * Cin) * Cout_p
    w_reads = N if n_co > 1 else 1
    bytes_accessed = (x.size * x.dtype.itemsize
                      + w_reads * w.size * w.dtype.itemsize
                      + N * M_pad * Cout_p * jnp.dtype(out_dtype).itemsize)

    out3 = pl.pallas_call(
        kernel,
        out_shape=jax.ShapeDtypeStruct((N, M_pad, Cout_p), out_dtype),
        grid_spec=pltpu.PrefetchScalarGridSpec(
            num_scalar_prefetch=0,
            grid=(N, n_co),
            in_specs=[
                pl.BlockSpec((1, R, Cin), lambda n, c: (n, 0, 0)),        # reused across c (no re-DMA)
                pl.BlockSpec((kh * kw, Cin, TN), lambda n, c: (0, 0, c)),
                pl.BlockSpec((1, TN), lambda n, c: (0, c)),
            ],
            out_specs=pl.BlockSpec((1, M_pad, TN), lambda n, c: (n, 0, c)),
        ),
        compiler_params=pltpu.CompilerParams(
            dimension_semantics=("parallel", "parallel"),
            vmem_limit_bytes=32 * 1024 * 1024,
        ),
        cost_estimate=pl.CostEstimate(flops=int(flops), transcendentals=0,
                                      bytes_accessed=int(bytes_accessed)),
    )(x, w, bias)

    # dense rows -> (N, OH_d, W_pad, Cout_p); strided/valid subsample; back to NCHW.
    out = out3[:, :M_out, :].reshape(N, OH_d, W_pad, Cout_p)
    out = out[:, ::stride, ::stride, :][:, :OH, :OW, :Cout]
    return jnp.transpose(out, (0, 3, 1, 2))


def _reference(x_nchw, weight, gamma, beta, running_mean, running_var,
               stride=1, padding=0, eps=1e-3):
    y = jax.lax.conv_general_dilated(
        x_nchw, weight, window_strides=(stride, stride),
        padding=[(padding, padding), (padding, padding)],
        dimension_numbers=("NCHW", "OIHW", "NCHW"))
    inv_std = 1.0 / jnp.sqrt(running_var + eps)
    y = (y - running_mean[None, :, None, None]) * (gamma * inv_std)[None, :, None, None] \
        + beta[None, :, None, None]
    return jnp.maximum(y, 0.0)


if __name__ == "__main__":
    key = jax.random.PRNGKey(0)
    k_x, k_w, k_g, k_b, k_m, k_v = jax.random.split(key, 6)

    N, Cin, H, W = 2, 4, 16, 16
    Cout, ksize, stride, padding = 8, 3, 1, 1

    x = jax.random.normal(k_x, (N, Cin, H, W), dtype=jnp.float32)
    weight = jax.random.normal(k_w, (Cout, Cin, ksize, ksize), dtype=jnp.float32) * 0.1
    gamma = 1.0 + 0.1 * jax.random.normal(k_g, (Cout,), dtype=jnp.float32)
    beta = 0.1 * jax.random.normal(k_b, (Cout,), dtype=jnp.float32)
    running_mean = 0.1 * jax.random.normal(k_m, (Cout,), dtype=jnp.float32)
    running_var = jnp.abs(jax.random.normal(k_v, (Cout,), dtype=jnp.float32)) + 0.5

    out = basic_conv2d_forward(x, weight, gamma, beta, running_mean, running_var,
                               stride=stride, padding=padding, eps=1e-3)
    out = jax.block_until_ready(out)

    ref = _reference(x, weight, gamma, beta, running_mean, running_var,
                     stride=stride, padding=padding, eps=1e-3)
    assert out.shape == (N, Cout, H, W)
    assert jnp.max(jnp.abs(out - ref)) < 1e-4, "mismatch vs reference"

    print("KERNEL_OK")
</pallas_src>

<mosaic_0001>
module attributes {stable_mosaic.version = 11 : i64} {
  func.func @_conv_bn_relu_kernel(%arg0: i32, %arg1: i32, %arg2: memref<1x326x4xf32, #tpu.memory_space<vmem>>, %arg3: memref<9x4x128xf32, #tpu.memory_space<vmem>>, %arg4: memref<1x128xf32, #tpu.memory_space<vmem>>, %arg5: memref<1x288x128xf32, #tpu.memory_space<vmem>>) attributes {dimension_semantics = [#tpu.dimension_semantics<parallel>, #tpu.dimension_semantics<parallel>], iteration_bounds = array<i64: 2, 1>, scalar_prefetch = 0 : i64, scratch_operands = 0 : i64, tpu.core_type = #tpu.core_type<tc>, window_params = [{transform_indices = @transform_0, window_bounds = array<i64: 1, 326, 4>}, {transform_indices = @transform_1, window_bounds = array<i64: 9, 4, 128>}, {transform_indices = @transform_2, window_bounds = array<i64: 1, 128>}, {transform_indices = @transform_3, window_bounds = array<i64: 1, 288, 128>}]} {
    %c0 = arith.constant 0 : index
    %c0_0 = arith.constant 0 : index
    %0 = vector.load %arg4[%c0, %c0_0] : memref<1x128xf32, #tpu.memory_space<vmem>>, vector<1x128xf32>
    %1 = vector.shape_cast %0 : vector<1x128xf32> to vector<1x128xf32>
    %2 = vector.broadcast %1 : vector<1x128xf32> to vector<288x128xf32>
    %c0_1 = arith.constant 0 : index
    %c0_2 = arith.constant 0 : index
    %c0_3 = arith.constant 0 : index
    %3 = vector.load %arg2[%c0_1, %c0_2, %c0_3] : memref<1x326x4xf32, #tpu.memory_space<vmem>>, vector<1x288x4xf32>
    %4 = vector.shape_cast %3 : vector<1x288x4xf32> to vector<288x4xf32>
    %c0_4 = arith.constant 0 : index
    %c0_5 = arith.constant 0 : index
    %c0_6 = arith.constant 0 : index
    %5 = vector.load %arg3[%c0_4, %c0_5, %c0_6] : memref<9x4x128xf32, #tpu.memory_space<vmem>>, vector<1x4x128xf32>
    %6 = vector.shape_cast %5 : vector<1x4x128xf32> to vector<4x128xf32>
    %cst = arith.constant dense<0.000000e+00> : vector<288x128xf32>
    %7 = tpu.matmul %4, %6, %cst {dimension_numbers = #tpu.dot_dimension_numbers<[1], [0], [0], [1], [0, 0, 1, 1], [], []>} : vector<288x4xf32>, vector<4x128xf32>, vector<288x128xf32> -> vector<288x128xf32>
    %8 = arith.addf %2, %7 : vector<288x128xf32>
    %c0_7 = arith.constant 0 : index
    %c1 = arith.constant 1 : index
    %c0_8 = arith.constant 0 : index
    %9 = vector.load %arg2[%c0_7, %c1, %c0_8] : memref<1x326x4xf32, #tpu.memory_space<vmem>>, vector<1x288x4xf32>
    %10 = vector.shape_cast %9 : vector<1x288x4xf32> to vector<288x4xf32>
    %c1_9 = arith.constant 1 : index
    %c0_10 = arith.constant 0 : index
    %c0_11 = arith.constant 0 : index
    %11 = vector.load %arg3[%c1_9, %c0_10, %c0_11] : memref<9x4x128xf32, #tpu.memory_space<vmem>>, vector<1x4x128xf32>
    %12 = vector.shape_cast %11 : vector<1x4x128xf32> to vector<4x128xf32>
    %cst_12 = arith.constant dense<0.000000e+00> : vector<288x128xf32>
    %13 = tpu.matmul %10, %12, %cst_12 {dimension_numbers = #tpu.dot_dimension_numbers<[1], [0], [0], [1], [0, 0, 1, 1], [], []>} : vector<288x4xf32>, vector<4x128xf32>, vector<288x128xf32> -> vector<288x128xf32>
    %14 = arith.addf %8, %13 : vector<288x128xf32>
    %c0_13 = arith.constant 0 : index
    %c2 = arith.constant 2 : index
    %c0_14 = arith.constant 0 : index
    %15 = vector.load %arg2[%c0_13, %c2, %c0_14] : memref<1x326x4xf32, #tpu.memory_space<vmem>>, vector<1x288x4xf32>
    %16 = vector.shape_cast %15 : vector<1x288x4xf32> to vector<288x4xf32>
    %c2_15 = arith.constant 2 : index
    %c0_16 = arith.constant 0 : index
    %c0_17 = arith.constant 0 : index
    %17 = vector.load %arg3[%c2_15, %c0_16, %c0_17] : memref<9x4x128xf32, #tpu.memory_space<vmem>>, vector<1x4x128xf32>
    %18 = vector.shape_cast %17 : vector<1x4x128xf32> to vector<4x128xf32>
    %cst_18 = arith.constant dense<0.000000e+00> : vector<288x128xf32>
    %19 = tpu.matmul %16, %18, %cst_18 {dimension_numbers = #tpu.dot_dimension_numbers<[1], [0], [0], [1], [0, 0, 1, 1], [], []>} : vector<288x4xf32>, vector<4x128xf32>, vector<288x128xf32> -> vector<288x128xf32>
    %20 = arith.addf %14, %19 : vector<288x128xf32>
    %c0_19 = arith.constant 0 : index
    %c18 = arith.constant 18 : index
    %c0_20 = arith.constant 0 : index
    %21 = vector.load %arg2[%c0_19, %c18, %c0_20] : memref<1x326x4xf32, #tpu.memory_space<vmem>>, vector<1x288x4xf32>
    %22 = vector.shape_cast %21 : vector<1x288x4xf32> to vector<288x4xf32>
    %c3 = arith.constant 3 : index
    %c0_21 = arith.constant 0 : index
    %c0_22 = arith.constant 0 : index
    %23 = vector.load %arg3[%c3, %c0_21, %c0_22] : memref<9x4x128xf32, #tpu.memory_space<vmem>>, vector<1x4x128xf32>
    %24 = vector.shape_cast %23 : vector<1x4x128xf32> to vector<4x128xf32>
    %cst_23 = arith.constant dense<0.000000e+00> : vector<288x128xf32>
    %25 = tpu.matmul %22, %24, %cst_23 {dimension_numbers = #tpu.dot_dimension_numbers<[1], [0], [0], [1], [0, 0, 1, 1], [], []>} : vector<288x4xf32>, vector<4x128xf32>, vector<288x128xf32> -> vector<288x128xf32>
    %26 = arith.addf %20, %25 : vector<288x128xf32>
    %c0_24 = arith.constant 0 : index
    %c19 = arith.constant 19 : index
    %c0_25 = arith.constant 0 : index
    %27 = vector.load %arg2[%c0_24, %c19, %c0_25] : memref<1x326x4xf32, #tpu.memory_space<vmem>>, vector<1x288x4xf32>
    %28 = vector.shape_cast %27 : vector<1x288x4xf32> to vector<288x4xf32>
    %c4 = arith.constant 4 : index
    %c0_26 = arith.constant 0 : index
    %c0_27 = arith.constant 0 : index
    %29 = vector.load %arg3[%c4, %c0_26, %c0_27] : memref<9x4x128xf32, #tpu.memory_space<vmem>>, vector<1x4x128xf32>
    %30 = vector.shape_cast %29 : vector<1x4x128xf32> to vector<4x128xf32>
    %cst_28 = arith.constant dense<0.000000e+00> : vector<288x128xf32>
    %31 = tpu.matmul %28, %30, %cst_28 {dimension_numbers = #tpu.dot_dimension_numbers<[1], [0], [0], [1], [0, 0, 1, 1], [], []>} : vector<288x4xf32>, vector<4x128xf32>, vector<288x128xf32> -> vector<288x128xf32>
    %32 = arith.addf %26, %31 : vector<288x128xf32>
    %c0_29 = arith.constant 0 : index
    %c20 = arith.constant 20 : index
    %c0_30 = arith.constant 0 : index
    %33 = vector.load %arg2[%c0_29, %c20, %c0_30] : memref<1x326x4xf32, #tpu.memory_space<vmem>>, vector<1x288x4xf32>
    %34 = vector.shape_cast %33 : vector<1x288x4xf32> to vector<288x4xf32>
    %c5 = arith.constant 5 : index
    %c0_31 = arith.constant 0 : index
    %c0_32 = arith.constant 0 : index
    %35 = vector.load %arg3[%c5, %c0_31, %c0_32] : memref<9x4x128xf32, #tpu.memory_space<vmem>>, vector<1x4x128xf32>
    %36 = vector.shape_cast %35 : vector<1x4x128xf32> to vector<4x128xf32>
    %cst_33 = arith.constant dense<0.000000e+00> : vector<288x128xf32>
    %37 = tpu.matmul %34, %36, %cst_33 {dimension_numbers = #tpu.dot_dimension_numbers<[1], [0], [0], [1], [0, 0, 1, 1], [], []>} : vector<288x4xf32>, vector<4x128xf32>, vector<288x128xf32> -> vector<288x128xf32>
    %38 = arith.addf %32, %37 : vector<288x128xf32>
    %c0_34 = arith.constant 0 : index
    %c36 = arith.constant 36 : index
    %c0_35 = arith.constant 0 : index
    %39 = vector.load %arg2[%c0_34, %c36, %c0_35] : memref<1x326x4xf32, #tpu.memory_space<vmem>>, vector<1x288x4xf32>
    %40 = vector.shape_cast %39 : vector<1x288x4xf32> to vector<288x4xf32>
    %c6 = arith.constant 6 : index
    %c0_36 = arith.constant 0 : index
    %c0_37 = arith.constant 0 : index
    %41 = vector.load %arg3[%c6, %c0_36, %c0_37] : memref<9x4x128xf32, #tpu.memory_space<vmem>>, vector<1x4x128xf32>
    %42 = vector.shape_cast %41 : vector<1x4x128xf32> to vector<4x128xf32>
    %cst_38 = arith.constant dense<0.000000e+00> : vector<288x128xf32>
    %43 = tpu.matmul %40, %42, %cst_38 {dimension_numbers = #tpu.dot_dimension_numbers<[1], [0], [0], [1], [0, 0, 1, 1], [], []>} : vector<288x4xf32>, vector<4x128xf32>, vector<288x128xf32> -> vector<288x128xf32>
    %44 = arith.addf %38, %43 : vector<288x128xf32>
    %c0_39 = arith.constant 0 : index
    %c37 = arith.constant 37 : index
    %c0_40 = arith.constant 0 : index
    %45 = vector.load %arg2[%c0_39, %c37, %c0_40] : memref<1x326x4xf32, #tpu.memory_space<vmem>>, vector<1x288x4xf32>
    %46 = vector.shape_cast %45 : vector<1x288x4xf32> to vector<288x4xf32>
    %c7 = arith.constant 7 : index
    %c0_41 = arith.constant 0 : index
    %c0_42 = arith.constant 0 : index
    %47 = vector.load %arg3[%c7, %c0_41, %c0_42] : memref<9x4x128xf32, #tpu.memory_space<vmem>>, vector<1x4x128xf32>
    %48 = vector.shape_cast %47 : vector<1x4x128xf32> to vector<4x128xf32>
    %cst_43 = arith.constant dense<0.000000e+00> : vector<288x128xf32>
    %49 = tpu.matmul %46, %48, %cst_43 {dimension_numbers = #tpu.dot_dimension_numbers<[1], [0], [0], [1], [0, 0, 1, 1], [], []>} : vector<288x4xf32>, vector<4x128xf32>, vector<288x128xf32> -> vector<288x128xf32>
    %50 = arith.addf %44, %49 : vector<288x128xf32>
    %c0_44 = arith.constant 0 : index
    %c38 = arith.constant 38 : index
    %c0_45 = arith.constant 0 : index
    %51 = vector.load %arg2[%c0_44, %c38, %c0_45] : memref<1x326x4xf32, #tpu.memory_space<vmem>>, vector<1x288x4xf32>
    %52 = vector.shape_cast %51 : vector<1x288x4xf32> to vector<288x4xf32>
    %c8 = arith.constant 8 : index
    %c0_46 = arith.constant 0 : index
    %c0_47 = arith.constant 0 : index
    %53 = vector.load %arg3[%c8, %c0_46, %c0_47] : memref<9x4x128xf32, #tpu.memory_space<vmem>>, vector<1x4x128xf32>
    %54 = vector.shape_cast %53 : vector<1x4x128xf32> to vector<4x128xf32>
    %cst_48 = arith.constant dense<0.000000e+00> : vector<288x128xf32>
    %55 = tpu.matmul %52, %54, %cst_48 {dimension_numbers = #tpu.dot_dimension_numbers<[1], [0], [0], [1], [0, 0, 1, 1], [], []>} : vector<288x4xf32>, vector<4x128xf32>, vector<288x128xf32> -> vector<288x128xf32>
    %56 = arith.addf %50, %55 : vector<288x128xf32>
    %cst_49 = arith.constant 0.000000e+00 : f32
    %57 = vector.broadcast %cst_49 : f32 to vector<288x128xf32>
    %58 = arith.maximumf %56, %57 : vector<288x128xf32>
    %c0_50 = arith.constant 0 : index
    %c0_51 = arith.constant 0 : index
    %c0_52 = arith.constant 0 : index
    %59 = vector.load %arg5[%c0_50, %c0_51, %c0_52] : memref<1x288x128xf32, #tpu.memory_space<vmem>>, vector<1x288x128xf32>
    %60 = vector.shape_cast %59 : vector<1x288x128xf32> to vector<288x128xf32>
    %61 = vector.shape_cast %58 : vector<288x128xf32> to vector<1x288x128xf32>
    tpu.vector_store %arg5[%c0_50, %c0_51, %c0_52], %61 {strides = array<i32>} : memref<1x288x128xf32, #tpu.memory_space<vmem>>, vector<1x288x128xf32>,
    return
  }
  func.func @transform_0(%arg0: i32, %arg1: i32) -> (i32, i32, i32) {
    %c0_i32 = arith.constant 0 : i32
    %c0_i32_0 = arith.constant 0 : i32
    %c0_i32_1 = arith.constant 0 : i32
    return %arg0, %c0_i32, %c0_i32_0 : i32, i32, i32
  }
  func.func @transform_1(%arg0: i32, %arg1: i32) -> (i32, i32, i32) {
    %c0_i32 = arith.constant 0 : i32
    %c0_i32_0 = arith.constant 0 : i32
    %c0_i32_1 = arith.constant 0 : i32
    return %c0_i32, %c0_i32_0, %arg1 : i32, i32, i32
  }
  func.func @transform_2(%arg0: i32, %arg1: i32) -> (i32, i32) {
    %c0_i32 = arith.constant 0 : i32
    %c0_i32_0 = arith.constant 0 : i32
    return %c0_i32, %arg1 : i32, i32
  }
  func.func @transform_3(%arg0: i32, %arg1: i32) -> (i32, i32, i32) {
    %c0_i32 = arith.constant 0 : i32
    %c0_i32_0 = arith.constant 0 : i32
    return %arg0, %c0_i32, %arg1 : i32, i32, i32
  }
}

</mosaic_0001>

<bundles_post_ra>
// kernel: basic_conv2d_forward.1
= control target key start
LH: loop header
LB: loop body
LE: loop exit
PB: predicated region body
PF: predicated region fallthrough
CT: control target
= control target key end

     0   :  { %s5539_s12 = smov 0   ;;  %s5541_s13 = smov 0   ;;  %s6876_s0 = inlined_call_operand.vmem [shape: f32[2,326,4], index: 0, kind: input, shape index: {}]   ;;  %s6877_s1 = inlined_call_operand.vmem [shape: f32[9,4,128], index: 1, kind: input, shape index: {}]   ;;  %s6878_s2 = inlined_call_operand.vmem [shape: f32[1,128], index: 2, kind: input, shape index: {}]   ;;  %s6879_s3 = inlined_call_operand.vmem [shape: f32[2,288,128], index: 3, kind: output, shape index: {}]  }
   0x1   :  { %s5543_s14 = smov 0  }
   0x2 LB: > { %s25_s15 = sadd.s32 1, %s5513_s13  ;;  %p4283_p0 = scmp.ge.s32.totalorder %s5517_s14, 1  ;;  %s5517_s14 = sphi %s5543_s14, %s13_s14   ;;  %s5513_s13 = sphi %s5541_s13, %s6881_s13   ;;  %s5509_s12 = sphi %s5539_s12, %s6880_s12  }
   0x3   : > { %p27_p1 = scmp.ge.s32.totalorder %s25_s15, 2  ;;  %p168_p2 = scmp.lt.s32.totalorder %s5517_s14, 3 }
   0x5   : > { %s6883_s15 = smov (%p27_p1, %s25_s15), 0  ;;  %p169_p3 = pnand %p4283_p0, %p168_p2 }
   0x6   : > { %p202_p4 = scmp.lt.s32.totalorder (!%p169_p3), %s5509_s12, 1 }
   0x7   : > { %172 = sbr.rel (%p169_p3) target bundleno = 540 (0x21c), region = 32 }
   0xc   : > { %v265_v0 = vld [vmem:[%s6877_s1] sm:$0xf]  ;;  %vm375_vm0 = vcmask 1043456   ;;  %v4324_v1 = vld [vmem:[%s6877_s1 + $0x4] sm:$0xf]  ;;  %s6885_s12 = smov (!%p202_p4, %s5509_s12), 1 }
   0xd   : > { %5467 = vmatprep.subr.msk.mxu1 %vm375_vm0, %v265_v0  ;;  %4963 = vmatprep.subr.msk.mxu0 %vm375_vm0, %v265_v0  ;;  %v4362_v2 = vld [vmem:[%s6877_s1 + $0x8] sm:$0xf]  ;;  %s5469_s22 = smul.u32 328, %s6885_s12  ;;  %vm266_vm1 = vcmask 31744   ;;  %v5593_v9 = vld [vmem:[%s6877_s1 + $0xc] sm:$0xf] }
   0xe   : > { %5468 = vmatpush3.msk.msra.mxu1 %vm375_vm0, %v265_v0  ;;  %4964 = vmatpush3.msk.msra.mxu0 %vm375_vm0, %v265_v0  ;;  %v5598_v10 = vld [vmem:[%s6877_s1 + $0x10] sm:$0xf]  ;;  %v5683_v47 = vld [vmem:[%s6877_s1 + $0x14] sm:$0xf]  ;;  %v5688_v48 = vld [vmem:[%s6877_s1 + $0x18] sm:$0xf] }
   0xf   : > { %5019 = vmatprep.subr.msk.mxu1 %vm375_vm0, %v4324_v1  ;;  %5075 = vmatprep.subr.msk.mxu0 %vm375_vm0, %v4362_v2  ;;  %s5578_s25 = scalar_lea.vmem %s6876_s0, %s5469_s22  ;;  %s5470_s17 = smul.u32 288, %s6885_s12 }
  0x10   : > { %v229_v3 = vld [vmem:[%s5578_s25] sm:$0xff]  ;;  %v247_v4 = vld [vmem:[%s5578_s25 + $0x90] sm:$0xff]  ;;  %v230_v5 = vld [vmem:[%s5578_s25 + $0x8] sm:$0xff] }
  0x11   : > { %4965 = vmatprep.mubr.msk.f32.mxu0 %vm266_vm1, %v229_v3  ;;  %4992 = vmatprep.mubr.msk.f32.mxu1 %vm266_vm1, %v247_v4  ;;  %v248_v6 = vld [vmem:[%s5578_s25 + $0x98] sm:$0xff]  ;;  %v231_v7 = vld [vmem:[%s5578_s25 + $0x10] sm:$0xff]  ;;  %v249_v8 = vld [vmem:[%s5578_s25 + $0xa0] sm:$0xff]  ;;  %s6795_s20 = scalar_lea.vmem %s6879_s3, %s5470_s17 }
  0x12   : > { %4966 = vmatmul.mubr.msk.f32.vlgmr.msra.gmra.mxu0 %vm266_vm1, %v230_v5  ;;  %4993 = vmatmul.mubr.msk.f32.vlgmr.msra.gmra.mxu1 %vm266_vm1, %v248_v6  ;;  %v232_v11 = vld [vmem:[%s5578_s25 + $0x18] sm:$0xff]  ;;  %v250_v12 = vld [vmem:[%s5578_s25 + $0xa8] sm:$0xff]  ;;  %v233_v13 = vld [vmem:[%s5578_s25 + $0x20] sm:$0xff] }
  0x13   : > { %5020 = vmatpush3.msk.msra.mxu1 %vm375_vm0, %v4324_v1  ;;  %5076 = vmatpush3.msk.msra.mxu0 %vm375_vm0, %v4362_v2  ;;  %v251_v14 = vld [vmem:[%s5578_s25 + $0xb0] sm:$0xff]  ;;  %v234_v15 = vld [vmem:[%s5578_s25 + $0x28] sm:$0xff]  ;;  %v252_v16 = vld [vmem:[%s5578_s25 + $0xb8] sm:$0xff] }
  0x14   : > { %4968 = vmatprep.mubr.msk.f32.mxu0 %vm266_vm1, %v231_v7  ;;  %4995 = vmatprep.mubr.msk.f32.mxu1 %vm266_vm1, %v249_v8  ;;  %v235_v17 = vld [vmem:[%s5578_s25 + $0x30] sm:$0xff]  ;;  %v253_v18 = vld [vmem:[%s5578_s25 + $0xc0] sm:$0xff]  ;;  %v236_v19 = vld [vmem:[%s5578_s25 + $0x38] sm:$0xff] }
  0x15   : > { %5131 = vmatprep.subr.msk.mxu1 %vm375_vm0, %v5593_v9  ;;  %5187 = vmatprep.subr.msk.mxu0 %vm375_vm0, %v5598_v10  ;;  %v254_v20 = vld [vmem:[%s5578_s25 + $0xc8] sm:$0xff]  ;;  %v237_v21 = vld [vmem:[%s5578_s25 + $0x40] sm:$0xff]  ;;  %v255_v22 = vld [vmem:[%s5578_s25 + $0xd0] sm:$0xff] }
  0x16   : > { %4969 = vmatmul.mubr.msk.f32.gmra.mxu0 %vm266_vm1, %v232_v11  ;;  %4996 = vmatmul.mubr.msk.f32.gmra.mxu1 %vm266_vm1, %v250_v12  ;;  %v238_v23 = vld [vmem:[%s5578_s25 + $0x48] sm:$0xff]  ;;  %v256_v24 = vld [vmem:[%s5578_s25 + $0xd8] sm:$0xff]  ;;  %v239_v25 = vld [vmem:[%s5578_s25 + $0x50] sm:$0xff] }
  0x17   : > { %4971 = vmatprep.mubr.msk.f32.mxu0 %vm266_vm1, %v233_v13  ;;  %4998 = vmatprep.mubr.msk.f32.mxu1 %vm266_vm1, %v251_v14  ;;  %v257_v26 = vld [vmem:[%s5578_s25 + $0xe0] sm:$0xff]  ;;  %v240_v27 = vld [vmem:[%s5578_s25 + $0x58] sm:$0xff]  ;;  %v258_v28 = vld [vmem:[%s5578_s25 + $0xe8] sm:$0xff] }
  0x18   : > { %v241_v29 = vld [vmem:[%s5578_s25 + $0x60] sm:$0xff]  ;;  %v259_v30 = vld [vmem:[%s5578_s25 + $0xf0] sm:$0xff]  ;;  %v242_v31 = vld [vmem:[%s5578_s25 + $0x68] sm:$0xff] }
  0x19   : > { %v260_v32 = vld [vmem:[%s5578_s25 + $0xf8] sm:$0xff]  ;;  %v243_v33 = vld [vmem:[%s5578_s25 + $0x70] sm:$0xff]  ;;  %v261_v34 = vld [vmem:[%s5578_s25 + $0x100] sm:$0xff] }
  0x1a   : > { %4972 = vmatmul.mubr.msk.f32.gmra.mxu0 %vm266_vm1, %v234_v15  ;;  %4999 = vmatmul.mubr.msk.f32.gmra.mxu1 %vm266_vm1, %v252_v16  ;;  %v244_v35 = vld [vmem:[%s5578_s25 + $0x78] sm:$0xff]  ;;  %v262_v36 = vld [vmem:[%s5578_s25 + $0x108] sm:$0xff]  ;;  %v245_v37 = vld [vmem:[%s5578_s25 + $0x80] sm:$0xff] }
  0x1b   : > { %4974 = vmatprep.mubr.msk.f32.mxu0 %vm266_vm1, %v235_v17  ;;  %5001 = vmatprep.mubr.msk.f32.mxu1 %vm266_vm1, %v253_v18  ;;  %v263_v38 = vld [vmem:[%s5578_s25 + $0x110] sm:$0xff]  ;;  %v246_v39 = vld [vmem:[%s5578_s25 + $0x88] sm:$0xff]  ;;  %v264_v40 = vld [vmem:[%s5578_s25 + $0x118] sm:$0xff] }
  0x1c   : > { %v660_v41 = vld [vmem:[%s5578_s25 + $0x1] sm:$0xff]  ;;  %v661_v43 = vld [vmem:[%s5578_s25 + $0x9] sm:$0xff]  ;;  %v662_v45 = vld [vmem:[%s5578_s25 + $0x11] sm:$0xff] }
  0x1d   : > { %v1090_v42 = vld [vmem:[%s5578_s25 + $0x2] sm:$0xff]  ;;  %v1091_v44 = vld [vmem:[%s5578_s25 + $0xa] sm:$0xff]  ;;  %v5676_v46 = vld [vmem:[%s5578_s25 + $0x12] sm:$0xff] }
  0x1e   : > { %4975 = vmatmul.mubr.msk.f32.gmra.mxu0 %vm266_vm1, %v236_v19  ;;  %5002 = vmatmul.mubr.msk.f32.gmra.mxu1 %vm266_vm1, %v254_v20  ;;  %v663_v49 = vld [vmem:[%s5578_s25 + $0x19] sm:$0xff]  ;;  %v664_v51 = vld [vmem:[%s5578_s25 + $0x21] sm:$0xff]  ;;  %v665_v53 = vld [vmem:[%s5578_s25 + $0x29] sm:$0xff] }
  0x1f   : > { %4977 = vmatprep.mubr.msk.f32.mxu0 %vm266_vm1, %v237_v21  ;;  %5004 = vmatprep.mubr.msk.f32.mxu1 %vm266_vm1, %v255_v22  ;;  %v5696_v50 = vld [vmem:[%s5578_s25 + $0x1a] sm:$0xff]  ;;  %v5703_v52 = vld [vmem:[%s5578_s25 + $0x22] sm:$0xff]  ;;  %v5717_v54 = vld [vmem:[%s5578_s25 + $0x2a] sm:$0xff] }
  0x20   : > { %v666_v55 = vld [vmem:[%s5578_s25 + $0x31] sm:$0xff]  ;;  %v667_v57 = vld [vmem:[%s5578_s25 + $0x39] sm:$0xff]  ;;  %v668_v59 = vld [vmem:[%s5578_s25 + $0x41] sm:$0xff] }
  0x21   : > { %v5721_v56 = vld [vmem:[%s5578_s25 + $0x32] sm:$0xff]  ;;  %v5731_v58 = vld [vmem:[%s5578_s25 + $0x3a] sm:$0xff]  ;;  %v5735_v60 = vld [vmem:[%s5578_s25 + $0x42] sm:$0xff] }
  0x22   : > { %4978 = vmatmul.mubr.msk.f32.gmra.mxu0 %vm266_vm1, %v238_v23  ;;  %5005 = vmatmul.mubr.msk.f32.gmra.mxu1 %vm266_vm1, %v256_v24  ;;  %v669_v61 = vld [vmem:[%s5578_s25 + $0x49] sm:$0xff]  ;;  %v670_v63 = vld [vmem:[%s5578_s25 + $0x51] sm:$0xff]  ;;  %v671_v1 = vld [vmem:[%s5578_s25 + $0x59] sm:$0xff] }
  0x23   : > { %4980 = vmatprep.mubr.msk.f32.mxu0 %vm266_vm1, %v239_v25  ;;  %5007 = vmatprep.mubr.msk.f32.mxu1 %vm266_vm1, %v257_v26  ;;  %v5745_v62 = vld [vmem:[%s5578_s25 + $0x4a] sm:$0xff]  ;;  %v5749_v0 = vld [vmem:[%s5578_s25 + $0x52] sm:$0xff]  ;;  %v5759_v2 = vld [vmem:[%s5578_s25 + $0x5a] sm:$0xff] }
  0x24   : > { %v672_v3 = vld [vmem:[%s5578_s25 + $0x61] sm:$0xff]  ;;  %v673_v5 = vld [vmem:[%s5578_s25 + $0x69] sm:$0xff]  ;;  %v674_v7 = vld [vmem:[%s5578_s25 + $0x71] sm:$0xff] }
  0x25   : > { %v5763_v4 = vld [vmem:[%s5578_s25 + $0x62] sm:$0xff]  ;;  %v5773_v6 = vld [vmem:[%s5578_s25 + $0x6a] sm:$0xff]  ;;  %v5777_v8 = vld [vmem:[%s5578_s25 + $0x72] sm:$0xff] }
  0x26   : > { %4981 = vmatmul.mubr.msk.f32.gmra.mxu0 %vm266_vm1, %v240_v27  ;;  %5008 = vmatmul.mubr.msk.f32.gmra.mxu1 %vm266_vm1, %v258_v28  ;;  %v676_v11 = vld [vmem:[%s5578_s25 + $0x81] sm:$0xff]  ;;  %v677_v13 = vld [vmem:[%s5578_s25 + $0x89] sm:$0xff]  ;;  %v678_v15 = vld [vmem:[%s5578_s25 + $0x91] sm:$0xff] }
  0x27   : > { %4983 = vmatprep.mubr.msk.f32.mxu0 %vm266_vm1, %v241_v29  ;;  %5010 = vmatprep.mubr.msk.f32.mxu1 %vm266_vm1, %v259_v30  ;;  %v5791_v12 = vld [vmem:[%s5578_s25 + $0x82] sm:$0xff]  ;;  %v5801_v14 = vld [vmem:[%s5578_s25 + $0x8a] sm:$0xff]  ;;  %v5805_v16 = vld [vmem:[%s5578_s25 + $0x92] sm:$0xff] }
  0x28   : > { %v679_v17 = vld [vmem:[%s5578_s25 + $0x99] sm:$0xff]  ;;  %v680_v19 = vld [vmem:[%s5578_s25 + $0xa1] sm:$0xff]  ;;  %v681_v21 = vld [vmem:[%s5578_s25 + $0xa9] sm:$0xff] }
  0x29   : > { %v5815_v18 = vld [vmem:[%s5578_s25 + $0x9a] sm:$0xff]  ;;  %v5819_v20 = vld [vmem:[%s5578_s25 + $0xa2] sm:$0xff]  ;;  %v5829_v22 = vld [vmem:[%s5578_s25 + $0xaa] sm:$0xff] }
  0x2a   : > { %4984 = vmatmul.mubr.msk.f32.gmra.mxu0 %vm266_vm1, %v242_v31  ;;  %5011 = vmatmul.mubr.msk.f32.gmra.mxu1 %vm266_vm1, %v260_v32  ;;  %v682_v23 = vld [vmem:[%s5578_s25 + $0xb1] sm:$0xff]  ;;  %v683_v25 = vld [vmem:[%s5578_s25 + $0xb9] sm:$0xff]  ;;  %v684_v27 = vld [vmem:[%s5578_s25 + $0xc1] sm:$0xff] }
  0x2b   : > { %4986 = vmatprep.mubr.msk.f32.mxu0 %vm266_vm1, %v243_v33  ;;  %5013 = vmatprep.mubr.msk.f32.mxu1 %vm266_vm1, %v261_v34  ;;  %v5833_v24 = vld [vmem:[%s5578_s25 + $0xb2] sm:$0xff]  ;;  %v5843_v26 = vld [vmem:[%s5578_s25 + $0xba] sm:$0xff]  ;;  %v5847_v28 = vld [vmem:[%s5578_s25 + $0xc2] sm:$0xff] }
  0x2c   : > { %v685_v29 = vld [vmem:[%s5578_s25 + $0xc9] sm:$0xff]  ;;  %v686_v31 = vld [vmem:[%s5578_s25 + $0xd1] sm:$0xff]  ;;  %v687_v33 = vld [vmem:[%s5578_s25 + $0xd9] sm:$0xff] }
  0x2d   : > { %v5857_v30 = vld [vmem:[%s5578_s25 + $0xca] sm:$0xff]  ;;  %v5861_v32 = vld [vmem:[%s5578_s25 + $0xd2] sm:$0xff]  ;;  %v5871_v34 = vld [vmem:[%s5578_s25 + $0xda] sm:$0xff] }
  0x2e   : > { %4987 = vmatmul.mubr.msk.f32.gmra.mxu0 %vm266_vm1, %v244_v35  ;;  %5014 = vmatmul.mubr.msk.f32.gmra.mxu1 %vm266_vm1, %v262_v36  ;;  %v688_v35 = vld [vmem:[%s5578_s25 + $0xe1] sm:$0xff] }
  0x2f   : > { %4989 = vmatprep.mubr.msk.f32.mxu0 %vm266_vm1, %v245_v37  ;;  %5016 = vmatprep.mubr.msk.f32.mxu1 %vm266_vm1, %v263_v38  ;;  %v5875_v36 = vld [vmem:[%s5578_s25 + $0xe2] sm:$0xff]  ;;  %v5885_v38 = vld [vmem:[%s5578_s25 + $0xea] sm:$0xff] }
  0x30   : > { %v689_v37 = vld [vmem:[%s5578_s25 + $0xe9] sm:$0xff] }
  0x32   : > { %4990 = vmatmul.mubr.msk.f32.gmra.mxu0 %vm266_vm1, %v246_v39  ;;  %5017 = vmatmul.mubr.msk.f32.gmra.mxu1 %vm266_vm1, %v264_v40  ;;  %v690_v39 = vld [vmem:[%s5578_s25 + $0xf1] sm:$0xff] }
  0x33   : > { %5021 = vmatprep.mubr.msk.f32.mxu1 %vm266_vm1, %v660_v41  ;;  %5077 = vmatprep.mubr.msk.f32.mxu0 %vm266_vm1, %v1090_v42  ;;  %v5889_v40 = vld [vmem:[%s5578_s25 + $0xf2] sm:$0xff]  ;;  %v5899_v42 = vld [vmem:[%s5578_s25 + $0xfa] sm:$0xff] }
  0x34   : > { %v691_v41 = vld [vmem:[%s5578_s25 + $0xf9] sm:$0xff] }
  0x36   : > { %5022 = vmatmul.mubr.msk.f32.vlgmr.msra.gmra.mxu1 %vm266_vm1, %v661_v43  ;;  %5078 = vmatmul.mubr.msk.f32.vlgmr.msra.gmra.mxu0 %vm266_vm1, %v1091_v44  ;;  %v692_v43 = vld [vmem:[%s5578_s25 + $0x101] sm:$0xff] }
  0x37   : > { %5132 = vmatpush3.msk.msra.mxu1 %vm375_vm0, %v5593_v9  ;;  %5188 = vmatpush3.msk.msra.mxu0 %vm375_vm0, %v5598_v10  ;;  %v675_v9 = vld [vmem:[%s5578_s25 + $0x79] sm:$0xff]  ;;  %v5903_v44 = vld [vmem:[%s5578_s25 + $0x102] sm:$0xff] }
  0x38   : > { %5024 = vmatprep.mubr.msk.f32.mxu1 %vm266_vm1, %v662_v45  ;;  %5080 = vmatprep.mubr.msk.f32.mxu0 %vm266_vm1, %v5676_v46  ;;  %v5787_v10 = vld [vmem:[%s5578_s25 + $0x7a] sm:$0xff]  ;;  %v693_v45 = vld [vmem:[%s5578_s25 + $0x109] sm:$0xff] }
  0x39   : > { %5243 = vmatprep.subr.msk.mxu1 %vm375_vm0, %v5683_v47  ;;  %5299 = vmatprep.subr.msk.mxu0 %vm375_vm0, %v5688_v48 }
  0x3a   : > { %5025 = vmatmul.mubr.msk.f32.gmra.mxu1 %vm266_vm1, %v663_v49  ;;  %5081 = vmatmul.mubr.msk.f32.gmra.mxu0 %vm266_vm1, %v5696_v50  ;;  %v5913_v49 = vld [vmem:[%s5578_s25 + $0x10a] sm:$0xff] }
  0x3b   : > { %5027 = vmatprep.mubr.msk.f32.mxu1 %vm266_vm1, %v664_v51  ;;  %5083 = vmatprep.mubr.msk.f32.mxu0 %vm266_vm1, %v5703_v52  ;;  %v694_v51 = vld [vmem:[%s5578_s25 + $0x111] sm:$0xff] }
  0x3e   : > { %5028 = vmatmul.mubr.msk.f32.gmra.mxu1 %vm266_vm1, %v665_v53  ;;  %5084 = vmatmul.mubr.msk.f32.gmra.mxu0 %vm266_vm1, %v5717_v54  ;;  %v5917_v53 = vld [vmem:[%s5578_s25 + $0x112] sm:$0xff] }
  0x3f   : > { %5030 = vmatprep.mubr.msk.f32.mxu1 %vm266_vm1, %v666_v55  ;;  %5086 = vmatprep.mubr.msk.f32.mxu0 %vm266_vm1, %v5721_v56  ;;  %v695_v55 = vld [vmem:[%s5578_s25 + $0x119] sm:$0xff] }
  0x42   : > { %5031 = vmatmul.mubr.msk.f32.gmra.mxu1 %vm266_vm1, %v667_v57  ;;  %5087 = vmatmul.mubr.msk.f32.gmra.mxu0 %vm266_vm1, %v5731_v58  ;;  %v5927_v57 = vld [vmem:[%s5578_s25 + $0x11a] sm:$0xff] }
  0x43   : > { %5033 = vmatprep.mubr.msk.f32.mxu1 %vm266_vm1, %v668_v59  ;;  %5089 = vmatprep.mubr.msk.f32.mxu0 %vm266_vm1, %v5735_v60  ;;  %v1950_v59 = vld [vmem:[%s5578_s25 + $0x13] sm:$0xff] }
  0x46   : > { %5034 = vmatmul.mubr.msk.f32.gmra.mxu1 %vm266_vm1, %v669_v61  ;;  %5090 = vmatmul.mubr.msk.f32.gmra.mxu0 %vm266_vm1, %v5745_v62  ;;  %v1951_v61 = vld [vmem:[%s5578_s25 + $0x1b] sm:$0xff] }
  0x47   : > { %5036 = vmatprep.mubr.msk.f32.mxu1 %vm266_vm1, %v670_v63  ;;  %5092 = vmatprep.mubr.msk.f32.mxu0 %vm266_vm1, %v5749_v0  ;;  %v1952_v63 = vld [vmem:[%s5578_s25 + $0x23] sm:$0xff] }
  0x4a   : > { %5037 = vmatmul.mubr.msk.f32.gmra.mxu1 %vm266_vm1, %v671_v1  ;;  %5093 = vmatmul.mubr.msk.f32.gmra.mxu0 %vm266_vm1, %v5759_v2  ;;  %v5944_v1 = vld [vmem:[%s6877_s1 + $0x1c] sm:$0xf] }
  0x4b   : > { %5039 = vmatprep.mubr.msk.f32.mxu1 %vm266_vm1, %v672_v3  ;;  %5095 = vmatprep.mubr.msk.f32.mxu0 %vm266_vm1, %v5763_v4  ;;  %v1954_v3 = vld [vmem:[%s5578_s25 + $0x33] sm:$0xff] }
  0x4e   : > { %5040 = vmatmul.mubr.msk.f32.gmra.mxu1 %vm266_vm1, %v673_v5  ;;  %5096 = vmatmul.mubr.msk.f32.gmra.mxu0 %vm266_vm1, %v5773_v6  ;;  %v1966_v5 = vld [vmem:[%s5578_s25 + $0x93] sm:$0xff] }
  0x4f   : > { %5042 = vmatprep.mubr.msk.f32.mxu1 %vm266_vm1, %v674_v7  ;;  %5098 = vmatprep.mubr.msk.f32.mxu0 %vm266_vm1, %v5777_v8  ;;  %v1968_v7 = vld [vmem:[%s5578_s25 + $0xa3] sm:$0xff] }
  0x52   : > { %5043 = vmatmul.mubr.msk.f32.gmra.mxu1 %vm266_vm1, %v675_v9  ;;  %5099 = vmatmul.mubr.msk.f32.gmra.mxu0 %vm266_vm1, %v5787_v10  ;;  %v1970_v9 = vld [vmem:[%s5578_s25 + $0xb3] sm:$0xff] }
  0x53   : > { %5045 = vmatprep.mubr.msk.f32.mxu1 %vm266_vm1, %v676_v11  ;;  %5101 = vmatprep.mubr.msk.f32.mxu0 %vm266_vm1, %v5791_v12  ;;  %v1972_v11 = vld [vmem:[%s5578_s25 + $0xc3] sm:$0xff] }
  0x56   : > { %5046 = vmatmul.mubr.msk.f32.gmra.mxu1 %vm266_vm1, %v677_v13  ;;  %5102 = vmatmul.mubr.msk.f32.gmra.mxu0 %vm266_vm1, %v5801_v14  ;;  %v1974_v13 = vld [vmem:[%s5578_s25 + $0xd3] sm:$0xff] }
  0x57   : > { %5048 = vmatprep.mubr.msk.f32.mxu1 %vm266_vm1, %v678_v15  ;;  %5104 = vmatprep.mubr.msk.f32.mxu0 %vm266_vm1, %v5805_v16  ;;  %v1976_v15 = vld [vmem:[%s5578_s25 + $0xe3] sm:$0xff] }
  0x5a   : > { %5049 = vmatmul.mubr.msk.f32.gmra.mxu1 %vm266_vm1, %v679_v17  ;;  %5105 = vmatmul.mubr.msk.f32.gmra.mxu0 %vm266_vm1, %v5815_v18  ;;  %v1978_v17 = vld [vmem:[%s5578_s25 + $0xf3] sm:$0xff] }
  0x5b   : > { %5051 = vmatprep.mubr.msk.f32.mxu1 %vm266_vm1, %v680_v19  ;;  %5107 = vmatprep.mubr.msk.f32.mxu0 %vm266_vm1, %v5819_v20  ;;  %v1980_v19 = vld [vmem:[%s5578_s25 + $0x103] sm:$0xff] }
  0x5e   : > { %5052 = vmatmul.mubr.msk.f32.gmra.mxu1 %vm266_vm1, %v681_v21  ;;  %5108 = vmatmul.mubr.msk.f32.gmra.mxu0 %vm266_vm1, %v5829_v22  ;;  %v1982_v21 = vld [vmem:[%s5578_s25 + $0x113] sm:$0xff] }
  0x5f   : > { %5054 = vmatprep.mubr.msk.f32.mxu1 %vm266_vm1, %v682_v23  ;;  %5110 = vmatprep.mubr.msk.f32.mxu0 %vm266_vm1, %v5833_v24  ;;  %v1554_v23 = vld [vmem:[%s5578_s25 + $0x122] sm:$0xff] }
  0x62   : > { %5055 = vmatmul.mubr.msk.f32.gmra.mxu1 %vm266_vm1, %v683_v25  ;;  %5111 = vmatmul.mubr.msk.f32.gmra.mxu0 %vm266_vm1, %v5843_v26  ;;  %v1555_v25 = vld [vmem:[%s5578_s25 + $0x12a] sm:$0xff] }
  0x63   : > { %5057 = vmatprep.mubr.msk.f32.mxu1 %vm266_vm1, %v684_v27  ;;  %5113 = vmatprep.mubr.msk.f32.mxu0 %vm266_vm1, %v5847_v28  ;;  %v2380_v27 = vld [vmem:[%s5578_s25 + $0x14] sm:$0xff] }
  0x66   : > { %5058 = vmatmul.mubr.msk.f32.gmra.mxu1 %vm266_vm1, %v685_v29  ;;  %5114 = vmatmul.mubr.msk.f32.gmra.mxu0 %vm266_vm1, %v5857_v30  ;;  %v2381_v29 = vld [vmem:[%s5578_s25 + $0x1c] sm:$0xff] }
  0x67   : > { %5060 = vmatprep.mubr.msk.f32.mxu1 %vm266_vm1, %v686_v31  ;;  %5116 = vmatprep.mubr.msk.f32.mxu0 %vm266_vm1, %v5861_v32  ;;  %v2812_v31 = vld [vmem:[%s5578_s25 + $0x34] sm:$0xff] }
  0x6a   : > { %5061 = vmatmul.mubr.msk.f32.gmra.mxu1 %vm266_vm1, %v687_v33  ;;  %5117 = vmatmul.mubr.msk.f32.gmra.mxu0 %vm266_vm1, %v5871_v34  ;;  %v2814_v33 = vld [vmem:[%s5578_s25 + $0x44] sm:$0xff] }
  0x6b   : > { %5063 = vmatprep.mubr.msk.f32.mxu1 %vm266_vm1, %v688_v35  ;;  %5119 = vmatprep.mubr.msk.f32.mxu0 %vm266_vm1, %v5875_v36  ;;  %v2816_v35 = vld [vmem:[%s5578_s25 + $0x54] sm:$0xff] }
  0x6e   : > { %5064 = vmatmul.mubr.msk.f32.gmra.mxu1 %vm266_vm1, %v689_v37  ;;  %5120 = vmatmul.mubr.msk.f32.gmra.mxu0 %vm266_vm1, %v5885_v38  ;;  %v2818_v37 = vld [vmem:[%s5578_s25 + $0x64] sm:$0xff] }
  0x6f   : > { %5066 = vmatprep.mubr.msk.f32.mxu1 %vm266_vm1, %v690_v39  ;;  %5122 = vmatprep.mubr.msk.f32.mxu0 %vm266_vm1, %v5889_v40 }
  0x72   : > { %5067 = vmatmul.mubr.msk.f32.gmra.mxu1 %vm266_vm1, %v691_v41  ;;  %5123 = vmatmul.mubr.msk.f32.gmra.mxu0 %vm266_vm1, %v5899_v42 }
  0x73   : > { %5069 = vmatprep.mubr.msk.f32.mxu1 %vm266_vm1, %v692_v43  ;;  %5125 = vmatprep.mubr.msk.f32.mxu0 %vm266_vm1, %v5903_v44  ;;  %v2820_v43 = vld [vmem:[%s5578_s25 + $0x74] sm:$0xff] }
  0x76   : > { %5070 = vmatmul.mubr.msk.f32.gmra.mxu1 %vm266_vm1, %v693_v45  ;;  %5126 = vmatmul.mubr.msk.f32.gmra.mxu0 %vm266_vm1, %v5913_v49 }
  0x77   : > { %5072 = vmatprep.mubr.msk.f32.mxu1 %vm266_vm1, %v694_v51  ;;  %5128 = vmatprep.mubr.msk.f32.mxu0 %vm266_vm1, %v5917_v53 }
  0x7a   : > { %5073 = vmatmul.mubr.msk.f32.gmra.mxu1 %vm266_vm1, %v695_v55  ;;  %5129 = vmatmul.mubr.msk.f32.gmra.mxu0 %vm266_vm1, %v5927_v57  ;;  %v2822_v55 = vld [vmem:[%s5578_s25 + $0x84] sm:$0xff] }
  0x7b   : > { %5133 = vmatprep.mubr.msk.f32.mxu1 %vm266_vm1, %v5676_v46  ;;  %5189 = vmatprep.mubr.msk.f32.mxu0 %vm266_vm1, %v1950_v59  ;;  %v5949_v46 = vld [vmem:[%s6877_s1 + $0x20] sm:$0xf] }
  0x7e   : > { %5134 = vmatmul.mubr.msk.f32.vlgmr.msra.gmra.mxu1 %vm266_vm1, %v5696_v50  ;;  %5190 = vmatmul.mubr.msk.f32.vlgmr.msra.gmra.mxu0 %vm266_vm1, %v1951_v61  ;;  %v1953_v50 = vld [vmem:[%s5578_s25 + $0x2b] sm:$0xff] }
  0x7f   : > { %5244 = vmatpush3.msk.msra.mxu1 %vm375_vm0, %v5683_v47  ;;  %5300 = vmatpush3.msk.msra.mxu0 %vm375_vm0, %v5688_v48  ;;  %v1955_v47 = vld [vmem:[%s5578_s25 + $0x3b] sm:$0xff]  ;;  %v1956_v48 = vld [vmem:[%s5578_s25 + $0x43] sm:$0xff]  ;;  %v2823_v61 = vld [vmem:[%s5578_s25 + $0x8c] sm:$0xff] }
  0x80   : > { %5136 = vmatprep.mubr.msk.f32.mxu1 %vm266_vm1, %v5703_v52  ;;  %5192 = vmatprep.mubr.msk.f32.mxu0 %vm266_vm1, %v1952_v63  ;;  %v1957_v52 = vld [vmem:[%s5578_s25 + $0x4b] sm:$0xff] }
  0x81   : > { %5355 = vmatprep.subr.msk.mxu1 %vm375_vm0, %v5944_v1  ;;  %5411 = vmatprep.subr.msk.mxu0 %vm375_vm0, %v5949_v46 }
  0x82   : > { %5137 = vmatmul.mubr.msk.f32.gmra.mxu1 %vm266_vm1, %v5717_v54  ;;  %5193 = vmatmul.mubr.msk.f32.gmra.mxu0 %vm266_vm1, %v1953_v50  ;;  %v1958_v54 = vld [vmem:[%s5578_s25 + $0x53] sm:$0xff] }
  0x83   : > { %5139 = vmatprep.mubr.msk.f32.mxu1 %vm266_vm1, %v5721_v56  ;;  %5195 = vmatprep.mubr.msk.f32.mxu0 %vm266_vm1, %v1954_v3  ;;  %v1959_v56 = vld [vmem:[%s5578_s25 + $0x5b] sm:$0xff] }
  0x86   : > { %5140 = vmatmul.mubr.msk.f32.gmra.mxu1 %vm266_vm1, %v5731_v58  ;;  %5196 = vmatmul.mubr.msk.f32.gmra.mxu0 %vm266_vm1, %v1955_v47  ;;  %v1960_v58 = vld [vmem:[%s5578_s25 + $0x63] sm:$0xff] }
  0x87   : > { %5142 = vmatprep.mubr.msk.f32.mxu1 %vm266_vm1, %v5735_v60  ;;  %5198 = vmatprep.mubr.msk.f32.mxu0 %vm266_vm1, %v1956_v48  ;;  %v1961_v60 = vld [vmem:[%s5578_s25 + $0x6b] sm:$0xff]  ;;  %v2825_v47 = vld [vmem:[%s5578_s25 + $0x9c] sm:$0xff] }
  0x8a   : > { %5143 = vmatmul.mubr.msk.f32.gmra.mxu1 %vm266_vm1, %v5745_v62  ;;  %5199 = vmatmul.mubr.msk.f32.gmra.mxu0 %vm266_vm1, %v1957_v52  ;;  %v1962_v62 = vld [vmem:[%s5578_s25 + $0x73] sm:$0xff] }
  0x8b   : > { %5145 = vmatprep.mubr.msk.f32.mxu1 %vm266_vm1, %v5749_v0  ;;  %5201 = vmatprep.mubr.msk.f32.mxu0 %vm266_vm1, %v1958_v54  ;;  %v1963_v0 = vld [vmem:[%s5578_s25 + $0x7b] sm:$0xff]  ;;  %v2826_v54 = vld [vmem:[%s5578_s25 + $0xa4] sm:$0xff] }
  0x8e   : > { %5146 = vmatmul.mubr.msk.f32.gmra.mxu1 %vm266_vm1, %v5759_v2  ;;  %5202 = vmatmul.mubr.msk.f32.gmra.mxu0 %vm266_vm1, %v1959_v56  ;;  %v1964_v2 = vld [vmem:[%s5578_s25 + $0x83] sm:$0xff] }
  0x8f   : > { %5148 = vmatprep.mubr.msk.f32.mxu1 %vm266_vm1, %v5763_v4  ;;  %5204 = vmatprep.mubr.msk.f32.mxu0 %vm266_vm1, %v1960_v58  ;;  %v1965_v4 = vld [vmem:[%s5578_s25 + $0x8b] sm:$0xff] }
  0x92   : > { %5149 = vmatmul.mubr.msk.f32.gmra.mxu1 %vm266_vm1, %v5773_v6  ;;  %5205 = vmatmul.mubr.msk.f32.gmra.mxu0 %vm266_vm1, %v1961_v60  ;;  %v1967_v6 = vld [vmem:[%s5578_s25 + $0x9b] sm:$0xff]  ;;  %v2827_v60 = vld [vmem:[%s5578_s25 + $0xac] sm:$0xff] }
  0x93   : > { %5151 = vmatprep.mubr.msk.f32.mxu1 %vm266_vm1, %v5777_v8  ;;  %5207 = vmatprep.mubr.msk.f32.mxu0 %vm266_vm1, %v1962_v62  ;;  %v1969_v8 = vld [vmem:[%s5578_s25 + $0xab] sm:$0xff] }
  0x96   : > { %5152 = vmatmul.mubr.msk.f32.gmra.mxu1 %vm266_vm1, %v5787_v10  ;;  %5208 = vmatmul.mubr.msk.f32.gmra.mxu0 %vm266_vm1, %v1963_v0  ;;  %v1971_v10 = vld [vmem:[%s5578_s25 + $0xbb] sm:$0xff] }
  0x97   : > { %5154 = vmatprep.mubr.msk.f32.mxu1 %vm266_vm1, %v5791_v12  ;;  %5210 = vmatprep.mubr.msk.f32.mxu0 %vm266_vm1, %v1964_v2  ;;  %v1973_v12 = vld [vmem:[%s5578_s25 + $0xcb] sm:$0xff]  ;;  %v2828_v2 = vld [vmem:[%s5578_s25 + $0xb4] sm:$0xff] }
  0x9a   : > { %5155 = vmatmul.mubr.msk.f32.gmra.mxu1 %vm266_vm1, %v5801_v14  ;;  %5211 = vmatmul.mubr.msk.f32.gmra.mxu0 %vm266_vm1, %v1965_v4  ;;  %v1975_v14 = vld [vmem:[%s5578_s25 + $0xdb] sm:$0xff] }
  0x9b   : > { %5157 = vmatprep.mubr.msk.f32.mxu1 %vm266_vm1, %v5805_v16  ;;  %5213 = vmatprep.mubr.msk.f32.mxu0 %vm266_vm1, %v1966_v5  ;;  %v1977_v16 = vld [vmem:[%s5578_s25 + $0xeb] sm:$0xff] }
  0x9e   : > { %5158 = vmatmul.mubr.msk.f32.gmra.mxu1 %vm266_vm1, %v5815_v18  ;;  %5214 = vmatmul.mubr.msk.f32.gmra.mxu0 %vm266_vm1, %v1967_v6  ;;  %v1979_v18 = vld [vmem:[%s5578_s25 + $0xfb] sm:$0xff] }
  0x9f   : > { %5160 = vmatprep.mubr.msk.f32.mxu1 %vm266_vm1, %v5819_v20  ;;  %5216 = vmatprep.mubr.msk.f32.mxu0 %vm266_vm1, %v1968_v7  ;;  %v1981_v20 = vld [vmem:[%s5578_s25 + $0x10b] sm:$0xff]  ;;  %v2829_v6 = vld [vmem:[%s5578_s25 + $0xbc] sm:$0xff] }
  0xa2   : > { %5161 = vmatmul.mubr.msk.f32.gmra.mxu1 %vm266_vm1, %v5829_v22  ;;  %5217 = vmatmul.mubr.msk.f32.gmra.mxu0 %vm266_vm1, %v1969_v8  ;;  %v1983_v22 = vld [vmem:[%s5578_s25 + $0x11b] sm:$0xff] }
  0xa3   : > { %5163 = vmatprep.mubr.msk.f32.mxu1 %vm266_vm1, %v5833_v24  ;;  %5219 = vmatprep.mubr.msk.f32.mxu0 %vm266_vm1, %v1970_v9  ;;  %v1984_v24 = vld [vmem:[%s5578_s25 + $0x123] sm:$0xff] }
  0xa4   : > { %v2830_v9 = vld [vmem:[%s5578_s25 + $0xc4] sm:$0xff] }
  0xa6   : > { %5164 = vmatmul.mubr.msk.f32.gmra.mxu1 %vm266_vm1, %v5843_v26  ;;  %5220 = vmatmul.mubr.msk.f32.gmra.mxu0 %vm266_vm1, %v1971_v10  ;;  %v1985_v26 = vld [vmem:[%s5578_s25 + $0x12b] sm:$0xff] }
  0xa7   : > { %5166 = vmatprep.mubr.msk.f32.mxu1 %vm266_vm1, %v5847_v28  ;;  %5222 = vmatprep.mubr.msk.f32.mxu0 %vm266_vm1, %v1972_v11  ;;  %v2810_v28 = vld [vmem:[%s5578_s25 + $0x24] sm:$0xff] }
  0xaa   : > { %5167 = vmatmul.mubr.msk.f32.gmra.mxu1 %vm266_vm1, %v5857_v30  ;;  %5223 = vmatmul.mubr.msk.f32.gmra.mxu0 %vm266_vm1, %v1973_v12  ;;  %v2811_v30 = vld [vmem:[%s5578_s25 + $0x2c] sm:$0xff] }
  0xab   : > { %5169 = vmatprep.mubr.msk.f32.mxu1 %vm266_vm1, %v5861_v32  ;;  %5225 = vmatprep.mubr.msk.f32.mxu0 %vm266_vm1, %v1974_v13  ;;  %v2813_v32 = vld [vmem:[%s5578_s25 + $0x3c] sm:$0xff]  ;;  %v2831_v12 = vld [vmem:[%s5578_s25 + $0xcc] sm:$0xff] }
  0xae   : > { %5170 = vmatmul.mubr.msk.f32.gmra.mxu1 %vm266_vm1, %v5871_v34  ;;  %5226 = vmatmul.mubr.msk.f32.gmra.mxu0 %vm266_vm1, %v1975_v14  ;;  %v2815_v34 = vld [vmem:[%s5578_s25 + $0x4c] sm:$0xff] }
  0xaf   : > { %5172 = vmatprep.mubr.msk.f32.mxu1 %vm266_vm1, %v5875_v36  ;;  %5228 = vmatprep.mubr.msk.f32.mxu0 %vm266_vm1, %v1976_v15  ;;  %v2817_v36 = vld [vmem:[%s5578_s25 + $0x5c] sm:$0xff]  ;;  %v2832_v15 = vld [vmem:[%s5578_s25 + $0xd4] sm:$0xff] }
  0xb2   : > { %5173 = vmatmul.mubr.msk.f32.gmra.mxu1 %vm266_vm1, %v5885_v38  ;;  %5229 = vmatmul.mubr.msk.f32.gmra.mxu0 %vm266_vm1, %v1977_v16  ;;  %v6224_v16 = vld [vmem:[%s6878_s2] ss:$0 sm:$0xff] }
  0xb3   : > { %5175 = vmatprep.mubr.msk.f32.mxu1 %vm266_vm1, %v5889_v40  ;;  %5231 = vmatprep.mubr.msk.f32.mxu0 %vm266_vm1, %v1978_v17  ;;  %v2819_v40 = vld [vmem:[%s5578_s25 + $0x6c] sm:$0xff] }
  0xb6   : > { %5176 = vmatmul.mubr.msk.f32.gmra.mxu1 %vm266_vm1, %v5899_v42  ;;  %5232 = vmatmul.mubr.msk.f32.gmra.mxu0 %vm266_vm1, %v1979_v18 }
  0xb7   : > { %5178 = vmatprep.mubr.msk.f32.mxu1 %vm266_vm1, %v5903_v44  ;;  %5234 = vmatprep.mubr.msk.f32.mxu0 %vm266_vm1, %v1980_v19 }
  0xba   : > { %5179 = vmatmul.mubr.msk.f32.gmra.mxu1 %vm266_vm1, %v5913_v49  ;;  %5235 = vmatmul.mubr.msk.f32.gmra.mxu0 %vm266_vm1, %v1981_v20  ;;  %v2821_v49 = vld [vmem:[%s5578_s25 + $0x7c] sm:$0xff] }
  0xbb   : > { %5181 = vmatprep.mubr.msk.f32.mxu1 %vm266_vm1, %v5917_v53  ;;  %5237 = vmatprep.mubr.msk.f32.mxu0 %vm266_vm1, %v1982_v21  ;;  %v2833_v20 = vld [vmem:[%s5578_s25 + $0xdc] sm:$0xff] }
  0xbe   : > { %5182 = vmatmul.mubr.msk.f32.gmra.mxu1 %vm266_vm1, %v5927_v57  ;;  %5238 = vmatmul.mubr.msk.f32.gmra.mxu0 %vm266_vm1, %v1983_v22 }
  0xbf   : > { %5184 = vmatprep.mubr.msk.f32.mxu1 %vm266_vm1, %v1554_v23  ;;  %5240 = vmatprep.mubr.msk.f32.mxu0 %vm266_vm1, %v1984_v24  ;;  %v2834_v23 = vld [vmem:[%s5578_s25 + $0xe4] sm:$0xff] }
  0xc2   : > { %5185 = vmatmul.mubr.msk.f32.gmra.mxu1 %vm266_vm1, %v1555_v25  ;;  %5241 = vmatmul.mubr.msk.f32.gmra.mxu0 %vm266_vm1, %v1985_v26 }
  0xc3   : > { %5245 = vmatprep.mubr.msk.f32.mxu1 %vm266_vm1, %v2380_v27  ;;  %5301 = vmatprep.mubr.msk.f32.mxu0 %vm266_vm1, %v2810_v28 }
  0xc6   : > { %5246 = vmatmul.mubr.msk.f32.vlgmr.msra.gmra.mxu1 %vm266_vm1, %v2381_v29  ;;  %5302 = vmatmul.mubr.msk.f32.vlgmr.msra.gmra.mxu0 %vm266_vm1, %v2811_v30 }
  0xc7   : > { %5356 = vmatpush3.msk.msra.mxu1 %vm375_vm0, %v5944_v1  ;;  %5412 = vmatpush3.msk.msra.mxu0 %vm375_vm0, %v5949_v46  ;;  %v2824_v46 = vld [vmem:[%s5578_s25 + $0x94] sm:$0xff] }
  0xc8   : > { %5248 = vmatprep.mubr.msk.f32.mxu1 %vm266_vm1, %v2810_v28  ;;  %5304 = vmatprep.mubr.msk.f32.mxu0 %vm266_vm1, %v2812_v31  ;;  %v2835_v28 = vld [vmem:[%s5578_s25 + $0xec] sm:$0xff] }
  0xca   : > { %5249 = vmatmul.mubr.msk.f32.gmra.mxu1 %vm266_vm1, %v2811_v30  ;;  %5305 = vmatmul.mubr.msk.f32.gmra.mxu0 %vm266_vm1, %v2813_v32 }
  0xcb   : > { %5251 = vmatprep.mubr.msk.f32.mxu1 %vm266_vm1, %v2812_v31  ;;  %5307 = vmatprep.mubr.msk.f32.mxu0 %vm266_vm1, %v2814_v33  ;;  %v2836_v31 = vld [vmem:[%s5578_s25 + $0xf4] sm:$0xff] }
  0xce   : > { %5252 = vmatmul.mubr.msk.f32.gmra.mxu1 %vm266_vm1, %v2813_v32  ;;  %5308 = vmatmul.mubr.msk.f32.gmra.mxu0 %vm266_vm1, %v2815_v34 }
  0xcf   : > { %5254 = vmatprep.mubr.msk.f32.mxu1 %vm266_vm1, %v2814_v33  ;;  %5310 = vmatprep.mubr.msk.f32.mxu0 %vm266_vm1, %v2816_v35 }
  0xd2   : > { %v6123_v38 = vpop.f32.mrf.mxu0  ;;  %v6125_v39 = vpop.f32.mrf.mxu1  ;;  %5255 = vmatmul.mubr.msk.f32.gmra.mxu1 %vm266_vm1, %v2815_v34  ;;  %5311 = vmatmul.mubr.msk.f32.gmra.mxu0 %vm266_vm1, %v2817_v36 }
  0xd3   : > { %5257 = vmatprep.mubr.msk.f32.mxu1 %vm266_vm1, %v2816_v35  ;;  %5313 = vmatprep.mubr.msk.f32.mxu0 %vm266_vm1, %v2818_v37  ;;  %v625_v32 = vadd.f32 %v6123_v38, %v6224_v16 }
  0xd4   : > { %v6132_v41 = vpop.f32.mrf.mxu0  ;;  %v6134_v42 = vpop.f32.mrf.mxu1 }
  0xd6   : > { %v6137_v44 = vpop.f32.mrf.mxu0  ;;  %v6139_v45 = vpop.f32.mrf.mxu1  ;;  %5258 = vmatmul.mubr.msk.f32.gmra.mxu1 %vm266_vm1, %v2817_v36  ;;  %5314 = vmatmul.mubr.msk.f32.gmra.mxu0 %vm266_vm1, %v2819_v40  ;;  %v624_v36 = vadd.f32 %v6224_v16, %v6132_v41 }
  0xd7   : > { %5260 = vmatprep.mubr.msk.f32.mxu1 %vm266_vm1, %v2818_v37  ;;  %5316 = vmatprep.mubr.msk.f32.mxu0 %vm266_vm1, %v2820_v43 }
  0xd8   : > { %v6146_v51 = vpop.f32.mrf.mxu0  ;;  %v6148_v53 = vpop.f32.mrf.mxu1 }
  0xd9   : > { %v626_v41 = vadd.f32 %v6224_v16, %v6146_v51 }
  0xda   : > { %v6151_v57 = vpop.f32.mrf.mxu0  ;;  %v6153_v59 = vpop.f32.mrf.mxu1  ;;  %5261 = vmatmul.mubr.msk.f32.gmra.mxu1 %vm266_vm1, %v2819_v40  ;;  %5317 = vmatmul.mubr.msk.f32.gmra.mxu0 %vm266_vm1, %v2821_v49  ;;  %v2837_v40 = vld [vmem:[%s5578_s25 + $0xfc] sm:$0xff] }
  0xdb   : > { %5263 = vmatprep.mubr.msk.f32.mxu1 %vm266_vm1, %v2820_v43  ;;  %5319 = vmatprep.mubr.msk.f32.mxu0 %vm266_vm1, %v2822_v55 }
  0xdc   : > { %v6160_v63 = vpop.f32.mrf.mxu0  ;;  %v6162_v1 = vpop.f32.mrf.mxu1 }
  0xde   : > { %v6165_v50 = vpop.f32.mrf.mxu0  ;;  %v6167_v3 = vpop.f32.mrf.mxu1  ;;  %5264 = vmatmul.mubr.msk.f32.gmra.mxu1 %vm266_vm1, %v2821_v49  ;;  %5320 = vmatmul.mubr.msk.f32.gmra.mxu0 %vm266_vm1, %v2823_v61  ;;  %v2838_v49 = vld [vmem:[%s5578_s25 + $0x104] sm:$0xff] }
  0xdf   : > { %5266 = vmatprep.mubr.msk.f32.mxu1 %vm266_vm1, %v2822_v55  ;;  %5322 = vmatprep.mubr.msk.f32.mxu0 %vm266_vm1, %v2824_v46  ;;  %v627_v55 = vadd.f32 %v6137_v44, %v6224_v16  ;;  %v2839_v44 = vld [vmem:[%s5578_s25 + $0x10c] sm:$0xff] }
  0xe0   : > { %v6174_v48 = vpop.f32.mrf.mxu0  ;;  %v6176_v52 = vpop.f32.mrf.mxu1 }
  0xe2   : > { %v6179_v56 = vpop.f32.mrf.mxu0  ;;  %v6181_v58 = vpop.f32.mrf.mxu1  ;;  %5267 = vmatmul.mubr.msk.f32.gmra.mxu1 %vm266_vm1, %v2823_v61  ;;  %5323 = vmatmul.mubr.msk.f32.gmra.mxu0 %vm266_vm1, %v2825_v47 }
  0xe3   : > { %5269 = vmatprep.mubr.msk.f32.mxu1 %vm266_vm1, %v2824_v46  ;;  %5325 = vmatprep.mubr.msk.f32.mxu0 %vm266_vm1, %v2826_v54 }
  0xe4   : > { %v6188_v62 = vpop.f32.mrf.mxu0  ;;  %v6190_v0 = vpop.f32.mrf.mxu1 }
  0xe6   : > { %v6193_v4 = vpop.f32.mrf.mxu0  ;;  %v6195_v5 = vpop.f32.mrf.mxu1  ;;  %5270 = vmatmul.mubr.msk.f32.gmra.mxu1 %vm266_vm1, %v2825_v47  ;;  %5326 = vmatmul.mubr.msk.f32.gmra.mxu0 %vm266_vm1, %v2827_v60 }
  0xe7   : > { %5272 = vmatprep.mubr.msk.f32.mxu1 %vm266_vm1, %v2826_v54  ;;  %5328 = vmatprep.mubr.msk.f32.mxu0 %vm266_vm1, %v2828_v2 }
  0xe8   : > { %v6202_v7 = vpop.f32.mrf.mxu0  ;;  %v6204_v8 = vpop.f32.mrf.mxu1 }
  0xea   : > { %v6207_v10 = vpop.f32.mrf.mxu0  ;;  %v6209_v11 = vpop.f32.mrf.mxu1  ;;  %5273 = vmatmul.mubr.msk.f32.gmra.mxu1 %vm266_vm1, %v2827_v60  ;;  %5329 = vmatmul.mubr.msk.f32.gmra.mxu0 %vm266_vm1, %v2829_v6 }
  0xeb   : > { %5275 = vmatprep.mubr.msk.f32.mxu1 %vm266_vm1, %v2828_v2  ;;  %5331 = vmatprep.mubr.msk.f32.mxu0 %vm266_vm1, %v2830_v9 }
  0xec   : > { %v6216_v13 = vpop.f32.mrf.mxu0  ;;  %v6218_v14 = vpop.f32.mrf.mxu1 }
  0xee   : > { %v6226_v17 = vpop.f32.mrf.mxu0  ;;  %v5015_v18 = vpop.f32.mrf.mxu1  ;;  %5276 = vmatmul.mubr.msk.f32.gmra.mxu1 %vm266_vm1, %v2829_v6  ;;  %5332 = vmatmul.mubr.msk.f32.gmra.mxu0 %vm266_vm1, %v2831_v12 }
  0xef   : > { %v6231_v19 = vadd.f32 %v5015_v18, %v6224_v16  ;;  %5278 = vmatprep.mubr.msk.f32.mxu1 %vm266_vm1, %v2830_v9  ;;  %5334 = vmatprep.mubr.msk.f32.mxu0 %vm266_vm1, %v2832_v15 }
  0xf0   : > { %v6236_v21 = vpop.f32.mrf.mxu0  ;;  %v605_v22 = vpop.f32.mrf.mxu1 }
  0xf1   : > { %v6240_v24 = vadd.f32 %v6224_v16, %v605_v22 }
  0xf2   : > { %v6242_v25 = vpop.f32.mrf.mxu0  ;;  %v5018_v26 = vpop.f32.mrf.mxu1  ;;  %5279 = vmatmul.mubr.msk.f32.gmra.mxu1 %vm266_vm1, %v2831_v12  ;;  %5335 = vmatmul.mubr.msk.f32.gmra.mxu0 %vm266_vm1, %v2833_v20  ;;  %v2840_v12 = vld [vmem:[%s5578_s25 + $0x114] sm:$0xff] }
  0xf3   : > { %v6247_v27 = vadd.f32 %v5018_v26, %v6224_v16  ;;  %5281 = vmatprep.mubr.msk.f32.mxu1 %vm266_vm1, %v2832_v15  ;;  %5337 = vmatprep.mubr.msk.f32.mxu0 %vm266_vm1, %v2834_v23  ;;  %v629_v15 = vadd.f32 %v6151_v57, %v6224_v16  ;;  %v2841_v57 = vld [vmem:[%s5578_s25 + $0x11c] sm:$0xff] }
  0xf4   : > { %v6252_v29 = vpop.f32.mrf.mxu0  ;;  %v615_v30 = vpop.f32.mrf.mxu1 }
  0xf5   : > { %v6258_v33 = vadd.f32 %v6224_v16, %v615_v30 }
  0xf6   : > { %v5023_v34 = vpop.f32.mrf.mxu1  ;;  %v5079_v35 = vpop.f32.mrf.mxu0  ;;  %5282 = vmatmul.mubr.msk.f32.gmra.mxu1 %vm266_vm1, %v2833_v20  ;;  %5338 = vmatmul.mubr.msk.f32.gmra.mxu0 %vm266_vm1, %v2835_v28 }
  0xf7   : > { %v1055_v37 = vadd.f32 %v5023_v34, %v625_v32  ;;  %5284 = vmatprep.mubr.msk.f32.mxu1 %vm266_vm1, %v2834_v23  ;;  %5340 = vmatprep.mubr.msk.f32.mxu0 %vm266_vm1, %v2836_v31  ;;  %v628_v23 = vadd.f32 %v6224_v16, %v6160_v63  ;;  %v2842_v32 = vld [vmem:[%s5578_s25 + $0x124] sm:$0xff]  ;;  %v631_v34 = vadd.f32 %v6165_v50, %v6224_v16  ;;  %v2843_v50 = vld [vmem:[%s5578_s25 + $0x12c] sm:$0xff] }
  0xf8   : > { %v875_v38 = vpop.f32.mrf.mxu1  ;;  %v1305_v43 = vpop.f32.mrf.mxu0 }
  0xf9   : > { %v6270_v61 = vadd.f32 %v5079_v35, %v1055_v37  ;;  %v1054_v46 = vadd.f32 %v875_v38, %v624_v36 }
  0xfa   : > { %v5026_v47 = vpop.f32.mrf.mxu1  ;;  %v5082_v54 = vpop.f32.mrf.mxu0  ;;  %5285 = vmatmul.mubr.msk.f32.gmra.mxu1 %vm266_vm1, %v2835_v28  ;;  %5341 = vmatmul.mubr.msk.f32.gmra.mxu0 %vm266_vm1, %v2837_v40 }
  0xfb   : > { %v6276_v60 = vadd.f32 %v1305_v43, %v1054_v46  ;;  %v1057_v2 = vadd.f32 %v5026_v47, %v627_v55  ;;  %5287 = vmatprep.mubr.msk.f32.mxu1 %vm266_vm1, %v2836_v31  ;;  %5343 = vmatprep.mubr.msk.f32.mxu0 %vm266_vm1, %v2838_v49  ;;  %v2844_v46 = vld [vmem:[%s5578_s25 + $0x134] sm:$0xff]  ;;  %v633_v47 = vadd.f32 %v6179_v56, %v6224_v16  ;;  %v2845_v56 = vld [vmem:[%s5578_s25 + $0x13c] sm:$0xff] }
  0xfc   : > { %v885_v6 = vpop.f32.mrf.mxu1  ;;  %v1315_v9 = vpop.f32.mrf.mxu0 }
  0xfd   : > { %v6284_v18 = vadd.f32 %v5082_v54, %v1057_v2  ;;  %v1056_v20 = vadd.f32 %v885_v6, %v626_v41 }
  0xfe   : > { %v5029_v51 = vpop.f32.mrf.mxu1  ;;  %v5085_v22 = vpop.f32.mrf.mxu0  ;;  %5288 = vmatmul.mubr.msk.f32.gmra.mxu1 %vm266_vm1, %v2837_v40  ;;  %5344 = vmatmul.mubr.msk.f32.gmra.mxu0 %vm266_vm1, %v2839_v44  ;;  %v630_v40 = vadd.f32 %v6224_v16, %v6174_v48 }
  0xff   : > { %v6290_v26 = vadd.f32 %v1315_v9, %v1056_v20  ;;  %v1059_v28 = vadd.f32 %v5029_v51, %v629_v15  ;;  %5290 = vmatprep.mubr.msk.f32.mxu1 %vm266_vm1, %v2838_v49  ;;  %5346 = vmatprep.mubr.msk.f32.mxu0 %vm266_vm1, %v2840_v12  ;;  %v3240_v20 = vld [vmem:[%s5578_s25 + $0x25] sm:$0xff] }
 0x100   : > { %v895_v30 = vpop.f32.mrf.mxu1  ;;  %v1325_v31 = vpop.f32.mrf.mxu0  ;;  %v3670_v51 = vld [vmem:[%s5578_s25 + $0x26] sm:$0xff] }
 0x101   : > { %v6298_v35 = vadd.f32 %v5085_v22, %v1059_v28  ;;  %v1058_v36 = vadd.f32 %v895_v30, %v628_v23  ;;  %v635_v22 = vadd.f32 %v6193_v4, %v6224_v16  ;;  %v634_v30 = vadd.f32 %v6224_v16, %v6202_v7  ;;  %v3241_v4 = vld [vmem:[%s5578_s25 + $0x2d] sm:$0xff] }
 0x102   : > { %v5032_v63 = vpop.f32.mrf.mxu1  ;;  %v5088_v37 = vpop.f32.mrf.mxu0  ;;  %5291 = vmatmul.mubr.msk.f32.gmra.mxu1 %vm266_vm1, %v2839_v44  ;;  %5347 = vmatmul.mubr.msk.f32.gmra.mxu0 %vm266_vm1, %v2841_v57  ;;  %v632_v44 = vadd.f32 %v6224_v16, %v6188_v62 }
 0x103   : > { %v6304_v38 = vadd.f32 %v1325_v31, %v1058_v36  ;;  %v1061_v43 = vadd.f32 %v5032_v63, %v631_v34  ;;  %5293 = vmatprep.mubr.msk.f32.mxu1 %vm266_vm1, %v2840_v12  ;;  %5349 = vmatprep.mubr.msk.f32.mxu0 %vm266_vm1, %v2842_v32  ;;  %v3671_v34 = vld [vmem:[%s5578_s25 + $0x2e] sm:$0xff] }
 0x104   : > { %v905_v49 = vpop.f32.mrf.mxu1  ;;  %v1335_v55 = vpop.f32.mrf.mxu0 }
 0x105   : > { %v6312_v54 = vadd.f32 %v5088_v37, %v1061_v43  ;;  %v1060_v48 = vadd.f32 %v905_v49, %v630_v40  ;;  %v3242_v37 = vld [vmem:[%s5578_s25 + $0x35] sm:$0xff]  ;;  %v637_v43 = vadd.f32 %v6207_v10, %v6224_v16  ;;  %v3243_v10 = vld [vmem:[%s5578_s25 + $0x3d] sm:$0xff] }
 0x106   : > { %v5035_v41 = vpop.f32.mrf.mxu1  ;;  %v5091_v2 = vpop.f32.mrf.mxu0  ;;  %5294 = vmatmul.mubr.msk.f32.gmra.mxu1 %vm266_vm1, %v2841_v57  ;;  %5350 = vmatmul.mubr.msk.f32.gmra.mxu0 %vm266_vm1, %v2843_v50  ;;  %v3672_v40 = vld [vmem:[%s5578_s25 + $0x36] sm:$0xff] }
 0x107   : > { %v6318_v6 = vadd.f32 %v1335_v55, %v1060_v48  ;;  %v1063_v9 = vadd.f32 %v5035_v41, %v633_v47  ;;  %5296 = vmatprep.mubr.msk.f32.mxu1 %vm266_vm1, %v2842_v32  ;;  %5352 = vmatprep.mubr.msk.f32.mxu0 %vm266_vm1, %v2844_v46  ;;  %v636_v46 = vadd.f32 %v6224_v16, %v6216_v13  ;;  %v3673_v41 = vld [vmem:[%s5578_s25 + $0x3e] sm:$0xff] }
 0x108   : > { %v915_v12 = vpop.f32.mrf.mxu1  ;;  %v1345_v15 = vpop.f32.mrf.mxu0 }
 0x109   : > { %v6327_v23 = vadd.f32 %v5091_v2, %v1063_v9  ;;  %v1062_v62 = vadd.f32 %v915_v12, %v632_v44  ;;  %v3244_v9 = vld [vmem:[%s5578_s25 + $0x45] sm:$0xff]  ;;  %v639_v12 = vadd.f32 %v6226_v17, %v6224_v16  ;;  %v3245_v17 = vld [vmem:[%s5578_s25 + $0x4d] sm:$0xff] }
 0x10a   : > { %v5038_v28 = vpop.f32.mrf.mxu1  ;;  %v5094_v57 = vpop.f32.mrf.mxu0  ;;  %5297 = vmatmul.mubr.msk.f32.gmra.mxu1 %vm266_vm1, %v2843_v50  ;;  %5353 = vmatmul.mubr.msk.f32.gmra.mxu0 %vm266_vm1, %v2845_v56  ;;  %v3674_v56 = vld [vmem:[%s5578_s25 + $0x46] sm:$0xff] }
 0x10b   : > { %v6333_v31 = vadd.f32 %v1345_v15, %v1062_v62  ;;  %v1065_v32 = vadd.f32 %v5038_v28, %v635_v22  ;;  %5357 = vmatprep.mubr.msk.f32.mxu1 %vm266_vm1, %v3240_v20  ;;  %5413 = vmatprep.mubr.msk.f32.mxu0 %vm266_vm1, %v3670_v51  ;;  %v638_v22 = vadd.f32 %v6224_v16, %v6236_v21 }
 0x10c   : > { %v925_v36 = vpop.f32.mrf.mxu1  ;;  %v1355_v63 = vpop.f32.mrf.mxu0 }
 0x10d   : > { %v6343_v7 = vadd.f32 %v5094_v57, %v1065_v32  ;;  %v1064_v50 = vadd.f32 %v925_v36, %v634_v30  ;;  %v3675_v57 = vld [vmem:[%s5578_s25 + $0x4e] sm:$0xff]  ;;  %v641_v36 = vadd.f32 %v6242_v25, %v6224_v16  ;;  %v3247_v25 = vld [vmem:[%s5578_s25 + $0x5d] sm:$0xff] }
 0x10e   : > { %v5041_v49 = vpop.f32.mrf.mxu1  ;;  %v5097_v55 = vpop.f32.mrf.mxu0  ;;  %5358 = vmatmul.mubr.msk.f32.vlgmr.msra.gmra.mxu1 %vm266_vm1, %v3241_v4  ;;  %5414 = vmatmul.mubr.msk.f32.vlgmr.msra.gmra.mxu0 %vm266_vm1, %v3671_v34  ;;  %v3246_v4 = vld [vmem:[%s5578_s25 + $0x55] sm:$0xff] }
 0x10f   : > { %v6349_v47 = vadd.f32 %v1355_v63, %v1064_v50  ;;  %v1067_v48 = vadd.f32 %v5041_v49, %v637_v43  ;;  %5360 = vmatprep.mubr.msk.f32.mxu1 %vm266_vm1, %v3242_v37  ;;  %5416 = vmatprep.mubr.msk.f32.mxu0 %vm266_vm1, %v3672_v40  ;;  %v3676_v34 = vld [vmem:[%s5578_s25 + $0x56] sm:$0xff]  ;;  %v640_v43 = vadd.f32 %v6224_v16, %v6252_v29 }
 0x110   : > { %v935_v2 = vpop.f32.mrf.mxu1  ;;  %v1365_v44 = vpop.f32.mrf.mxu0 }
 0x111   : > { %v6359_v13 = vadd.f32 %v5097_v55, %v1067_v48  ;;  %v1066_v15 = vadd.f32 %v935_v2, %v636_v46  ;;  %v3677_v55 = vld [vmem:[%s5578_s25 + $0x5e] sm:$0xff]  ;;  %v643_v2 = vadd.f32 %v6125_v39, %v6224_v16  ;;  %v3249_v39 = vld [vmem:[%s5578_s25 + $0x6d] sm:$0xff] }
 0x112   : > { %v5044_v20 = vpop.f32.mrf.mxu1  ;;  %v5100_v51 = vpop.f32.mrf.mxu0  ;;  %5361 = vmatmul.mubr.msk.f32.gmra.mxu1 %vm266_vm1, %v3243_v10  ;;  %5417 = vmatmul.mubr.msk.f32.gmra.mxu0 %vm266_vm1, %v3673_v41  ;;  %v3248_v10 = vld [vmem:[%s5578_s25 + $0x65] sm:$0xff] }
 0x113   : > { %v6365_v62 = vadd.f32 %v1365_v44, %v1066_v15  ;;  %v1069_v28 = vadd.f32 %v5044_v20, %v639_v12  ;;  %5363 = vmatprep.mubr.msk.f32.mxu1 %vm266_vm1, %v3244_v9  ;;  %5419 = vmatprep.mubr.msk.f32.mxu0 %vm266_vm1, %v3674_v56  ;;  %v3678_v41 = vld [vmem:[%s5578_s25 + $0x66] sm:$0xff]  ;;  %v642_v12 = vadd.f32 %v6224_v16, %v6134_v42 }
 0x114   : > { %v945_v30 = vpop.f32.mrf.mxu1  ;;  %v1375_v32 = vpop.f32.mrf.mxu0 }
 0x115   : > { %v6375_v21 = vadd.f32 %v5100_v51, %v1069_v28  ;;  %v1068_v63 = vadd.f32 %v945_v30, %v638_v22  ;;  %v3679_v51 = vld [vmem:[%s5578_s25 + $0x6e] sm:$0xff]  ;;  %v645_v30 = vadd.f32 %v6139_v45, %v6224_v16  ;;  %v3251_v45 = vld [vmem:[%s5578_s25 + $0x7d] sm:$0xff] }
 0x116   : > { %v5047_v37 = vpop.f32.mrf.mxu1  ;;  %v5103_v40 = vpop.f32.mrf.mxu0  ;;  %5364 = vmatmul.mubr.msk.f32.gmra.mxu1 %vm266_vm1, %v3245_v17  ;;  %5420 = vmatmul.mubr.msk.f32.gmra.mxu0 %vm266_vm1, %v3675_v57  ;;  %v3250_v17 = vld [vmem:[%s5578_s25 + $0x75] sm:$0xff] }
 0x117   : > { %v6381_v50 = vadd.f32 %v1375_v32, %v1068_v63  ;;  %v1071_v49 = vadd.f32 %v5047_v37, %v641_v36  ;;  %5366 = vmatprep.mubr.msk.f32.mxu1 %vm266_vm1, %v3246_v4  ;;  %5422 = vmatprep.mubr.msk.f32.mxu0 %vm266_vm1, %v3676_v34  ;;  %v3680_v57 = vld [vmem:[%s5578_s25 + $0x76] sm:$0xff]  ;;  %v644_v36 = vadd.f32 %v6224_v16, %v6148_v53 }
 0x118   : > { %v955_v46 = vpop.f32.mrf.mxu1  ;;  %v1385_v48 = vpop.f32.mrf.mxu0 }
 0x119   : > { %v6391_v29 = vadd.f32 %v5103_v40, %v1071_v49  ;;  %v1070_v44 = vadd.f32 %v955_v46, %v640_v43  ;;  %v3681_v40 = vld [vmem:[%s5578_s25 + $0x7e] sm:$0xff]  ;;  %v647_v46 = vadd.f32 %v6153_v59, %v6224_v16  ;;  %v3253_v59 = vld [vmem:[%s5578_s25 + $0x8d] sm:$0xff] }
 0x11a   : > { %v5050_v9 = vpop.f32.mrf.mxu1  ;;  %v5106_v56 = vpop.f32.mrf.mxu0  ;;  %5367 = vmatmul.mubr.msk.f32.gmra.mxu1 %vm266_vm1, %v3247_v25  ;;  %5423 = vmatmul.mubr.msk.f32.gmra.mxu0 %vm266_vm1, %v3677_v55  ;;  %v3252_v25 = vld [vmem:[%s5578_s25 + $0x85] sm:$0xff] }
 0x11b   : > { %v6397_v15 = vadd.f32 %v1385_v48, %v1070_v44  ;;  %v1073_v20 = vadd.f32 %v5050_v9, %v643_v2  ;;  %5369 = vmatprep.mubr.msk.f32.mxu1 %vm266_vm1, %v3248_v10  ;;  %5425 = vmatprep.mubr.msk.f32.mxu0 %vm266_vm1, %v3678_v41  ;;  %v3682_v55 = vld [vmem:[%s5578_s25 + $0x86] sm:$0xff]  ;;  %v646_v2 = vadd.f32 %v6224_v16, %v6162_v1 }
 0x11c   : > { %v965_v22 = vpop.f32.mrf.mxu1  ;;  %v1395_v28 = vpop.f32.mrf.mxu0 }
 0x11d   : > { %v6407_v42 = vadd.f32 %v5106_v56, %v1073_v20  ;;  %v1072_v32 = vadd.f32 %v965_v22, %v642_v12  ;;  %v3683_v56 = vld [vmem:[%s5578_s25 + $0x8e] sm:$0xff]  ;;  %v649_v22 = vadd.f32 %v6167_v3, %v6224_v16  ;;  %v3255_v3 = vld [vmem:[%s5578_s25 + $0x9d] sm:$0xff] }
 0x11e   : > { %v5053_v4 = vpop.f32.mrf.mxu1  ;;  %v5109_v34 = vpop.f32.mrf.mxu0  ;;  %5370 = vmatmul.mubr.msk.f32.gmra.mxu1 %vm266_vm1, %v3249_v39  ;;  %5426 = vmatmul.mubr.msk.f32.gmra.mxu0 %vm266_vm1, %v3679_v51  ;;  %v3254_v39 = vld [vmem:[%s5578_s25 + $0x95] sm:$0xff] }
 0x11f   : > { %v6413_v63 = vadd.f32 %v1395_v28, %v1072_v32  ;;  %v1075_v37 = vadd.f32 %v5053_v4, %v645_v30  ;;  %5372 = vmatprep.mubr.msk.f32.mxu1 %vm266_vm1, %v3250_v17  ;;  %5428 = vmatprep.mubr.msk.f32.mxu0 %vm266_vm1, %v3680_v57  ;;  %v3684_v51 = vld [vmem:[%s5578_s25 + $0x96] sm:$0xff]  ;;  %v648_v30 = vadd.f32 %v6224_v16, %v6176_v52 }
 0x120   : > { %v975_v43 = vpop.f32.mrf.mxu1  ;;  %v1405_v49 = vpop.f32.mrf.mxu0 }
 0x121   : > { %v6423_v53 = vadd.f32 %v5109_v34, %v1075_v37  ;;  %v1074_v48 = vadd.f32 %v975_v43, %v644_v36  ;;  %v3685_v34 = vld [vmem:[%s5578_s25 + $0x9e] sm:$0xff]  ;;  %v651_v43 = vadd.f32 %v6181_v58, %v6224_v16  ;;  %v3257_v58 = vld [vmem:[%s5578_s25 + $0xad] sm:$0xff] }
 0x122   : > { %v5056_v10 = vpop.f32.mrf.mxu1  ;;  %v5112_v41 = vpop.f32.mrf.mxu0  ;;  %5373 = vmatmul.mubr.msk.f32.gmra.mxu1 %vm266_vm1, %v3251_v45  ;;  %5429 = vmatmul.mubr.msk.f32.gmra.mxu0 %vm266_vm1, %v3681_v40  ;;  %v3256_v45 = vld [vmem:[%s5578_s25 + $0xa5] sm:$0xff] }
 0x123   : > { %v6429_v44 = vadd.f32 %v1405_v49, %v1074_v48  ;;  %v1077_v9 = vadd.f32 %v5056_v10, %v647_v46  ;;  %5375 = vmatprep.mubr.msk.f32.mxu1 %vm266_vm1, %v3252_v25  ;;  %5431 = vmatprep.mubr.msk.f32.mxu0 %vm266_vm1, %v3682_v55  ;;  %v3686_v40 = vld [vmem:[%s5578_s25 + $0xa6] sm:$0xff]  ;;  %v650_v46 = vadd.f32 %v6224_v16, %v6190_v0 }
 0x124   : > { %v985_v12 = vpop.f32.mrf.mxu1  ;;  %v1415_v20 = vpop.f32.mrf.mxu0 }
 0x125   : > { %v6439_v1 = vadd.f32 %v5112_v41, %v1077_v9  ;;  %v1076_v28 = vadd.f32 %v985_v12, %v646_v2  ;;  %v3687_v41 = vld [vmem:[%s5578_s25 + $0xae] sm:$0xff]  ;;  %v653_v12 = vadd.f32 %v6195_v5, %v6224_v16  ;;  %v3259_v5 = vld [vmem:[%s5578_s25 + $0xbd] sm:$0xff] }
 0x126   : > { %v5059_v17 = vpop.f32.mrf.mxu1  ;;  %v5115_v57 = vpop.f32.mrf.mxu0  ;;  %5376 = vmatmul.mubr.msk.f32.gmra.mxu1 %vm266_vm1, %v3253_v59  ;;  %5432 = vmatmul.mubr.msk.f32.gmra.mxu0 %vm266_vm1, %v3683_v56  ;;  %v3258_v59 = vld [vmem:[%s5578_s25 + $0xb5] sm:$0xff] }
 0x127   : > { %v6445_v32 = vadd.f32 %v1415_v20, %v1076_v28  ;;  %v1079_v4 = vadd.f32 %v5059_v17, %v649_v22  ;;  %5378 = vmatprep.mubr.msk.f32.mxu1 %vm266_vm1, %v3254_v39  ;;  %5434 = vmatprep.mubr.msk.f32.mxu0 %vm266_vm1, %v3684_v51  ;;  %v3688_v56 = vld [vmem:[%s5578_s25 + $0xb6] sm:$0xff]  ;;  %v652_v22 = vadd.f32 %v6224_v16, %v6204_v8 }
 0x128   : > { %v995_v36 = vpop.f32.mrf.mxu1  ;;  %v1425_v37 = vpop.f32.mrf.mxu0 }
 0x129   : > { %v6455_v52 = vadd.f32 %v5115_v57, %v1079_v4  ;;  %v1078_v49 = vadd.f32 %v995_v36, %v648_v30  ;;  %v3689_v57 = vld [vmem:[%s5578_s25 + $0xbe] sm:$0xff]  ;;  %v655_v36 = vadd.f32 %v6209_v11, %v6224_v16  ;;  %v3261_v11 = vld [vmem:[%s5578_s25 + $0xcd] sm:$0xff] }
 0x12a   : > { %v5062_v25 = vpop.f32.mrf.mxu1  ;;  %v5118_v55 = vpop.f32.mrf.mxu0  ;;  %5379 = vmatmul.mubr.msk.f32.gmra.mxu1 %vm266_vm1, %v3255_v3  ;;  %5435 = vmatmul.mubr.msk.f32.gmra.mxu0 %vm266_vm1, %v3685_v34  ;;  %v3260_v3 = vld [vmem:[%s5578_s25 + $0xc5] sm:$0xff] }
 0x12b   : > { %v6461_v48 = vadd.f32 %v1425_v37, %v1078_v49  ;;  %v1081_v10 = vadd.f32 %v5062_v25, %v651_v43  ;;  %5381 = vmatprep.mubr.msk.f32.mxu1 %vm266_vm1, %v3256_v45  ;;  %5437 = vmatprep.mubr.msk.f32.mxu0 %vm266_vm1, %v3686_v40  ;;  %v3690_v34 = vld [vmem:[%s5578_s25 + $0xc6] sm:$0xff]  ;;  %v654_v43 = vadd.f32 %v6224_v16, %v6218_v14 }
 0x12c   : > { %v1005_v2 = vpop.f32.mrf.mxu1  ;;  %v1435_v9 = vpop.f32.mrf.mxu0 }
 0x12d   : > { %v6471_v0 = vadd.f32 %v5118_v55, %v1081_v10  ;;  %v1080_v20 = vadd.f32 %v1005_v2, %v650_v46  ;;  %v3691_v55 = vld [vmem:[%s5578_s25 + $0xce] sm:$0xff] }
 0x12e   : > { %v5065_v39 = vpop.f32.mrf.mxu1  ;;  %v5121_v51 = vpop.f32.mrf.mxu0  ;;  %5382 = vmatmul.mubr.msk.f32.gmra.mxu1 %vm266_vm1, %v3257_v58  ;;  %5438 = vmatmul.mubr.msk.f32.gmra.mxu0 %vm266_vm1, %v3687_v41  ;;  %v3262_v58 = vld [vmem:[%s5578_s25 + $0xd5] sm:$0xff] }
 0x12f   : > { %v6477_v28 = vadd.f32 %v1435_v9, %v1080_v20  ;;  %v1083_v17 = vadd.f32 %v5065_v39, %v653_v12  ;;  %5384 = vmatprep.mubr.msk.f32.mxu1 %vm266_vm1, %v3258_v59  ;;  %5440 = vmatprep.mubr.msk.f32.mxu0 %vm266_vm1, %v3688_v56  ;;  %v3692_v41 = vld [vmem:[%s5578_s25 + $0xd6] sm:$0xff]  ;;  %v3693_v20 = vld [vmem:[%s5578_s25 + $0xde] sm:$0xff] }
 0x130   : > { %v1015_v30 = vpop.f32.mrf.mxu1  ;;  %v1445_v4 = vpop.f32.mrf.mxu0  ;;  %v3263_v12 = vld [vmem:[%s5578_s25 + $0xdd] sm:$0xff] }
 0x131   : > { %v6487_v8 = vadd.f32 %v5121_v51, %v1083_v17  ;;  %v1082_v37 = vadd.f32 %v1015_v30, %v652_v22  ;;  %v3264_v22 = vld [vmem:[%s5578_s25 + $0xe5] sm:$0xff] }
 0x132   : > { %v5068_v45 = vpop.f32.mrf.mxu1  ;;  %v5124_v40 = vpop.f32.mrf.mxu0  ;;  %5385 = vmatmul.mubr.msk.f32.gmra.mxu1 %vm266_vm1, %v3259_v5  ;;  %5441 = vmatmul.mubr.msk.f32.gmra.mxu0 %vm266_vm1, %v3689_v57  ;;  %v3694_v17 = vld [vmem:[%s5578_s25 + $0xe6] sm:$0xff] }
 0x133   : > { %v6493_v49 = vadd.f32 %v1445_v4, %v1082_v37  ;;  %v1085_v25 = vadd.f32 %v5068_v45, %v655_v36  ;;  %5387 = vmatprep.mubr.msk.f32.mxu1 %vm266_vm1, %v3260_v3  ;;  %5443 = vmatprep.mubr.msk.f32.mxu0 %vm266_vm1, %v3690_v34  ;;  %v3265_v34 = vld [vmem:[%s5578_s25 + $0xed] sm:$0xff]  ;;  %v3266_v45 = vld [vmem:[%s5578_s25 + $0xf5] sm:$0xff] }
 0x134   : > { %v1025_v46 = vpop.f32.mrf.mxu1  ;;  %v1455_v10 = vpop.f32.mrf.mxu0  ;;  %v3695_v36 = vld [vmem:[%s5578_s25 + $0xee] sm:$0xff] }
 0x135   : > { %v6501_v2 = vadd.f32 %v5124_v40, %v1085_v25  ;;  %v1084_v14 = vadd.f32 %v1025_v46, %v654_v43  ;;  %v3696_v40 = vld [vmem:[%s5578_s25 + $0xf6] sm:$0xff] }
 0x136   : > { %v5071_v16 = vpop.f32.mrf.mxu1  ;;  %v5127_v9 = vpop.f32.mrf.mxu0  ;;  %5388 = vmatmul.mubr.msk.f32.gmra.mxu1 %vm266_vm1, %v3261_v11  ;;  %5444 = vmatmul.mubr.msk.f32.gmra.mxu0 %vm266_vm1, %v3691_v55 }
 0x137   : > { %v6505_v59 = vadd.f32 %v1455_v10, %v1084_v14  ;;  %v1087_v56 = vadd.f32 %v5071_v16, %v6231_v19  ;;  %5390 = vmatprep.mubr.msk.f32.mxu1 %vm266_vm1, %v3262_v58  ;;  %5446 = vmatprep.mubr.msk.f32.mxu0 %vm266_vm1, %v3692_v41  ;;  %v3267_v10 = vld [vmem:[%s5578_s25 + $0xfd] sm:$0xff]  ;;  %v3268_v14 = vld [vmem:[%s5578_s25 + $0x105] sm:$0xff] }
 0x138   : > { %v1035_v39 = vpop.f32.mrf.mxu1  ;;  %v1465_v51 = vpop.f32.mrf.mxu0  ;;  %v3697_v58 = vld [vmem:[%s5578_s25 + $0xfe] sm:$0xff]  ;;  %v3698_v16 = vld [vmem:[%s5578_s25 + $0x106] sm:$0xff] }
 0x139   : > { %v6514_v5 = vadd.f32 %v5127_v9, %v1087_v56  ;;  %v1086_v57 = vadd.f32 %v1035_v39, %v6240_v24 }
 0x13a   : > { %v5074_v30 = vpop.f32.mrf.mxu1  ;;  %v5130_v19 = vpop.f32.mrf.mxu0  ;;  %5391 = vmatmul.mubr.msk.f32.gmra.mxu1 %vm266_vm1, %v3263_v12  ;;  %5447 = vmatmul.mubr.msk.f32.gmra.mxu0 %vm266_vm1, %v3693_v20 }
 0x13b   : > { %v6519_v4 = vadd.f32 %v1465_v51, %v1086_v57  ;;  %v1089_v3 = vadd.f32 %v5074_v30, %v6247_v27  ;;  %5393 = vmatprep.mubr.msk.f32.mxu1 %vm266_vm1, %v3264_v22  ;;  %5449 = vmatprep.mubr.msk.f32.mxu0 %vm266_vm1, %v3694_v17  ;;  %v3269_v51 = vld [vmem:[%s5578_s25 + $0x10d] sm:$0xff]  ;;  %v3270_v57 = vld [vmem:[%s5578_s25 + $0x115] sm:$0xff] }
 0x13c   : > { %v1045_v37 = vpop.f32.mrf.mxu1  ;;  %v1475_v24 = vpop.f32.mrf.mxu0  ;;  %v3699_v22 = vld [vmem:[%s5578_s25 + $0x10e] sm:$0xff]  ;;  %v3700_v30 = vld [vmem:[%s5578_s25 + $0x116] sm:$0xff] }
 0x13d   : > { %v6528_v43 = vadd.f32 %v5130_v19, %v1089_v3  ;;  %v1088_v25 = vadd.f32 %v1045_v37, %v6258_v33 }
 0x13e   : > { %v5135_v11 = vpop.f32.mrf.mxu1  ;;  %v5191_v27 = vpop.f32.mrf.mxu0  ;;  %5394 = vmatmul.mubr.msk.f32.gmra.mxu1 %vm266_vm1, %v3265_v34  ;;  %5450 = vmatmul.mubr.msk.f32.gmra.mxu0 %vm266_vm1, %v3695_v36 }
 0x13f   : > { %v6533_v55 = vadd.f32 %v1475_v24, %v1088_v25  ;;  %v1915_v46 = vadd.f32 %v5135_v11, %v6270_v61  ;;  %5396 = vmatprep.mubr.msk.f32.mxu1 %vm266_vm1, %v3266_v45  ;;  %5452 = vmatprep.mubr.msk.f32.mxu0 %vm266_vm1, %v3696_v40  ;;  %v3271_v24 = vld [vmem:[%s5578_s25 + $0x11d] sm:$0xff]  ;;  %v3272_v25 = vld [vmem:[%s5578_s25 + $0x125] sm:$0xff] }
 0x140   : > { %v1735_v41 = vpop.f32.mrf.mxu1  ;;  %v2165_v33 = vpop.f32.mrf.mxu0  ;;  %v3701_v45 = vld [vmem:[%s5578_s25 + $0x11e] sm:$0xff]  ;;  %v3702_v11 = vld [vmem:[%s5578_s25 + $0x126] sm:$0xff] }
 0x141   : > { %v6542_v9 = vadd.f32 %v5191_v27, %v1915_v46  ;;  %v1914_v56 = vadd.f32 %v1735_v41, %v6276_v60 }
 0x142   : > { %v5138_v12 = vpop.f32.mrf.mxu1  ;;  %v5194_v61 = vpop.f32.mrf.mxu0  ;;  %5397 = vmatmul.mubr.msk.f32.gmra.mxu1 %vm266_vm1, %v3267_v10  ;;  %5453 = vmatmul.mubr.msk.f32.gmra.mxu0 %vm266_vm1, %v3697_v58 }
 0x143   : > { %v6547_v20 = vadd.f32 %v2165_v33, %v1914_v56  ;;  %v1917_v39 = vadd.f32 %v5138_v12, %v6284_v18  ;;  %5399 = vmatprep.mubr.msk.f32.mxu1 %vm266_vm1, %v3268_v14  ;;  %5455 = vmatprep.mubr.msk.f32.mxu0 %vm266_vm1, %v3698_v16  ;;  %v3273_v33 = vld [vmem:[%s5578_s25 + $0x12d] sm:$0xff]  ;;  %v3274_v56 = vld [vmem:[%s5578_s25 + $0x135] sm:$0xff] }
 0x144   : > { %v1745_v17 = vpop.f32.mrf.mxu1  ;;  %v2175_v60 = vpop.f32.mrf.mxu0  ;;  %v3703_v14 = vld [vmem:[%s5578_s25 + $0x12e] sm:$0xff]  ;;  %v3704_v12 = vld [vmem:[%s5578_s25 + $0x136] sm:$0xff] }
 0x145   : > { %v6556_v19 = vadd.f32 %v5194_v61, %v1917_v39  ;;  %v1916_v3 = vadd.f32 %v1745_v17, %v6290_v26 }
 0x146   : > { %v5141_v34 = vpop.f32.mrf.mxu1  ;;  %v5197_v18 = vpop.f32.mrf.mxu0  ;;  %5400 = vmatmul.mubr.msk.f32.gmra.mxu1 %vm266_vm1, %v3269_v51  ;;  %5456 = vmatmul.mubr.msk.f32.gmra.mxu0 %vm266_vm1, %v3699_v22 }
 0x147   : > { %v6561_v36 = vadd.f32 %v2175_v60, %v1916_v3  ;;  %v1919_v37 = vadd.f32 %v5141_v34, %v6298_v35  ;;  %5402 = vmatprep.mubr.msk.f32.mxu1 %vm266_vm1, %v3270_v57  ;;  %5458 = vmatprep.mubr.msk.f32.mxu0 %vm266_vm1, %v3700_v30  ;;  %v3275_v60 = vld [vmem:[%s5578_s25 + $0x13d] sm:$0xff] }
 0x148   : > { %v1755_v40 = vpop.f32.mrf.mxu1  ;;  %v2185_v26 = vpop.f32.mrf.mxu0  ;;  %v3705_v57 = vld [vmem:[%s5578_s25 + $0x13e] sm:$0xff] }
 0x149   : > { %v6570_v27 = vadd.f32 %v5197_v18, %v1919_v37  ;;  %v1918_v46 = vadd.f32 %v1755_v40, %v6304_v38 }
 0x14a   : > { %v5144_v10 = vpop.f32.mrf.mxu1  ;;  %v5200_v35 = vpop.f32.mrf.mxu0  ;;  %5403 = vmatmul.mubr.msk.f32.gmra.mxu1 %vm266_vm1, %v3271_v24  ;;  %5459 = vmatmul.mubr.msk.f32.gmra.mxu0 %vm266_vm1, %v3701_v45 }
 0x14b   : > { %v6575_v58 = vadd.f32 %v2185_v26, %v1918_v46  ;;  %v1921_v41 = vadd.f32 %v5144_v10, %v6312_v54  ;;  %5405 = vmatprep.mubr.msk.f32.mxu1 %vm266_vm1, %v3272_v25  ;;  %5461 = vmatprep.mubr.msk.f32.mxu0 %vm266_vm1, %v3702_v11 }
 0x14c   : > { %v1765_v16 = vpop.f32.mrf.mxu1  ;;  %v2195_v38 = vpop.f32.mrf.mxu0 }
 0x14d   : > { %v6584_v61 = vadd.f32 %v5200_v35, %v1921_v41  ;;  %v1920_v39 = vadd.f32 %v1765_v16, %v6318_v6 }
 0x14e   : > { %v5147_v51 = vpop.f32.mrf.mxu1  ;;  %v5203_v22 = vpop.f32.mrf.mxu0  ;;  %5406 = vmatmul.mubr.msk.f32.gmra.mxu1 %vm266_vm1, %v3273_v33  ;;  %5462 = vmatmul.mubr.msk.f32.gmra.mxu0 %vm266_vm1, %v3703_v14 }
 0x14f   : > { %v6589_v54 = vadd.f32 %v2195_v38, %v1920_v39  ;;  %v1923_v17 = vadd.f32 %v5147_v51, %v6327_v23  ;;  %5408 = vmatprep.mubr.msk.f32.mxu1 %vm266_vm1, %v3274_v56  ;;  %5464 = vmatprep.mubr.msk.f32.mxu0 %vm266_vm1, %v3704_v12 }
 0x150   : > { %v1775_v30 = vpop.f32.mrf.mxu1  ;;  %v2205_v3 = vpop.f32.mrf.mxu0 }
 0x151   : > { %v6596_v34 = vadd.f32 %v5203_v22, %v1923_v17  ;;  %v1922_v6 = vadd.f32 %v1775_v30, %v6333_v31 }
 0x152   : > { %v5150_v18 = vpop.f32.mrf.mxu1  ;;  %v5206_v37 = vpop.f32.mrf.mxu0  ;;  %5409 = vmatmul.mubr.msk.f32.gmra.mxu1 %vm266_vm1, %v3275_v60  ;;  %5465 = vmatmul.mubr.msk.f32.gmra.mxu0 %vm266_vm1, %v3705_v57 }
 0x153   : > { %v6601_v24 = vadd.f32 %v2205_v3, %v1922_v6  ;;  %v1925_v23 = vadd.f32 %v5150_v18, %v6343_v7 }
 0x154   : > { %v1785_v45 = vpop.f32.mrf.mxu1  ;;  %v2215_v40 = vpop.f32.mrf.mxu0 }
 0x155   : > { %v6604_v26 = vadd.f32 %v5206_v37, %v1925_v23  ;;  %v1924_v25 = vadd.f32 %v1785_v45, %v6349_v47 }
 0x156   : > { %v5153_v11 = vpop.f32.mrf.mxu1  ;;  %v5209_v46 = vpop.f32.mrf.mxu0 }
 0x157   : > { %v6607_v10 = vadd.f32 %v2215_v40, %v1924_v25  ;;  %v1927_v31 = vadd.f32 %v5153_v11, %v6359_v13 }
 0x158   : > { %v1795_v35 = vpop.f32.mrf.mxu1  ;;  %v2225_v41 = vpop.f32.mrf.mxu0 }
 0x159   : > { %v6610_v33 = vadd.f32 %v5209_v46, %v1927_v31  ;;  %v1926_v14 = vadd.f32 %v1795_v35, %v6365_v62 }
 0x15a   : > { %v5156_v16 = vpop.f32.mrf.mxu1  ;;  %v5212_v7 = vpop.f32.mrf.mxu0 }
 0x15b   : > { %v6613_v38 = vadd.f32 %v2225_v41, %v1926_v14  ;;  %v1929_v56 = vadd.f32 %v5156_v16, %v6375_v21 }
 0x15c   : > { %v1805_v12 = vpop.f32.mrf.mxu1  ;;  %v2235_v47 = vpop.f32.mrf.mxu0 }
 0x15d   : > { %v6616_v39 = vadd.f32 %v5212_v7, %v1929_v56  ;;  %v1928_v51 = vadd.f32 %v1805_v12, %v6381_v50 }
 0x15e   : > { %v5159_v22 = vpop.f32.mrf.mxu1  ;;  %v5215_v13 = vpop.f32.mrf.mxu0 }
 0x15f   : > { %v6619_v17 = vadd.f32 %v2235_v47, %v1928_v51  ;;  %v1931_v60 = vadd.f32 %v5159_v22, %v6391_v29 }
 0x160   : > { %v1815_v57 = vpop.f32.mrf.mxu1  ;;  %v2245_v62 = vpop.f32.mrf.mxu0 }
 0x161   : > { %v6622_v30 = vadd.f32 %v5215_v13, %v1931_v60  ;;  %v1930_v3 = vadd.f32 %v1815_v57, %v6397_v15 }
 0x162   : > { %v5162_v6 = vpop.f32.mrf.mxu1  ;;  %v5218_v21 = vpop.f32.mrf.mxu0 }
 0x163   : > { %v6625_v18 = vadd.f32 %v2245_v62, %v1930_v3  ;;  %v1933_v37 = vadd.f32 %v5162_v6, %v6407_v42 }
 0x164   : > { %v1825_v23 = vpop.f32.mrf.mxu1  ;;  %v2255_v50 = vpop.f32.mrf.mxu0 }
 0x165   : > { %v6628_v45 = vadd.f32 %v5218_v21, %v1933_v37  ;;  %v1932_v40 = vadd.f32 %v1825_v23, %v6413_v63 }
 0x166   : > { %v5165_v25 = vpop.f32.mrf.mxu1  ;;  %v5221_v29 = vpop.f32.mrf.mxu0 }
 0x167   : > { %v6631_v11 = vadd.f32 %v2255_v50, %v1932_v40  ;;  %v1935_v46 = vadd.f32 %v5165_v25, %v6423_v53 }
 0x168   : > { %v1835_v31 = vpop.f32.mrf.mxu1  ;;  %v2265_v15 = vpop.f32.mrf.mxu0 }
 0x169   : > { %v6634_v35 = vadd.f32 %v5221_v29, %v1935_v46  ;;  %v1934_v41 = vadd.f32 %v1835_v31, %v6429_v44 }
 0x16a   : > { %v5168_v14 = vpop.f32.mrf.mxu1  ;;  %v5224_v42 = vpop.f32.mrf.mxu0 }
 0x16b   : > { %v6637_v16 = vadd.f32 %v2265_v15, %v1934_v41  ;;  %v1937_v7 = vadd.f32 %v5168_v14, %v6439_v1 }
 0x16c   : > { %v1845_v56 = vpop.f32.mrf.mxu1  ;;  %v2275_v63 = vpop.f32.mrf.mxu0 }
 0x16d   : > { %v6640_v12 = vadd.f32 %v5224_v42, %v1937_v7  ;;  %v1936_v47 = vadd.f32 %v1845_v56, %v6445_v32 }
 0x16e   : > { %v5171_v51 = vpop.f32.mrf.mxu1  ;;  %v5227_v53 = vpop.f32.mrf.mxu0 }
 0x16f   : > { %v6643_v22 = vadd.f32 %v2275_v63, %v1936_v47  ;;  %v1939_v13 = vadd.f32 %v5171_v51, %v6455_v52 }
 0x170   : > { %v1855_v60 = vpop.f32.mrf.mxu1  ;;  %v2285_v44 = vpop.f32.mrf.mxu0 }
 0x171   : > { %v6646_v57 = vadd.f32 %v5227_v53, %v1939_v13  ;;  %v1938_v62 = vadd.f32 %v1855_v60, %v6461_v48 }
 0x172   : > { %v5174_v3 = vpop.f32.mrf.mxu1  ;;  %v5230_v1 = vpop.f32.mrf.mxu0 }
 0x173   : > { %v6649_v6 = vadd.f32 %v2285_v44, %v1938_v62  ;;  %v1941_v21 = vadd.f32 %v5174_v3, %v6471_v0 }
 0x174   : > { %v1865_v37 = vpop.f32.mrf.mxu1  ;;  %v2295_v32 = vpop.f32.mrf.mxu0 }
 0x175   : > { %v6652_v23 = vadd.f32 %v5230_v1, %v1941_v21  ;;  %v1940_v50 = vadd.f32 %v1865_v37, %v6477_v28 }
 0x176   : > { %v5177_v40 = vpop.f32.mrf.mxu1  ;;  %v5233_v52 = vpop.f32.mrf.mxu0 }
 0x177   : > { %v6655_v25 = vadd.f32 %v2295_v32, %v1940_v50  ;;  %v1943_v29 = vadd.f32 %v5177_v40, %v6487_v8 }
 0x178   : > { %v1875_v46 = vpop.f32.mrf.mxu1  ;;  %v2305_v48 = vpop.f32.mrf.mxu0 }
 0x179   : > { %v6658_v31 = vadd.f32 %v5233_v52, %v1943_v29  ;;  %v1942_v15 = vadd.f32 %v1875_v46, %v6493_v49 }
 0x17a   : > { %v5180_v41 = vpop.f32.mrf.mxu1  ;;  %v5236_v0 = vpop.f32.mrf.mxu0 }
 0x17b   : > { %v6661_v14 = vadd.f32 %v2305_v48, %v1942_v15  ;;  %v1945_v42 = vadd.f32 %v5180_v41, %v6501_v2 }
 0x17c   : > { %v1885_v7 = vpop.f32.mrf.mxu1  ;;  %v2315_v28 = vpop.f32.mrf.mxu0 }
 0x17d   : > { %v6664_v56 = vadd.f32 %v5236_v0, %v1945_v42  ;;  %v1944_v63 = vadd.f32 %v1885_v7, %v6505_v59 }
 0x17e   : > { %v5183_v47 = vpop.f32.mrf.mxu1  ;;  %v5239_v8 = vpop.f32.mrf.mxu0 }
 0x17f   : > { %v6667_v51 = vadd.f32 %v2315_v28, %v1944_v63  ;;  %v1947_v53 = vadd.f32 %v5183_v47, %v6514_v5 }
 0x180   : > { %v1895_v13 = vpop.f32.mrf.mxu1  ;;  %v2325_v49 = vpop.f32.mrf.mxu0 }
 0x181   : > { %v6670_v60 = vadd.f32 %v5239_v8, %v1947_v53  ;;  %v1946_v44 = vadd.f32 %v1895_v13, %v6519_v4 }
 0x182   : > { %v5186_v62 = vpop.f32.mrf.mxu1  ;;  %v5242_v2 = vpop.f32.mrf.mxu0 }
 0x183   : > { %v6673_v3 = vadd.f32 %v2325_v49, %v1946_v44  ;;  %v1949_v1 = vadd.f32 %v5186_v62, %v6528_v43 }
 0x184   : > { %v1905_v21 = vpop.f32.mrf.mxu1  ;;  %v2335_v59 = vpop.f32.mrf.mxu0 }
 0x185   : > { %v6676_v37 = vadd.f32 %v5242_v2, %v1949_v1  ;;  %v1948_v32 = vadd.f32 %v1905_v21, %v6533_v55 }
 0x186   : > { %v5247_v50 = vpop.f32.mrf.mxu1  ;;  %v5303_v5 = vpop.f32.mrf.mxu0 }
 0x187   : > { %v6679_v40 = vadd.f32 %v2335_v59, %v1948_v32  ;;  %v2775_v52 = vadd.f32 %v5247_v50, %v6542_v9 }
 0x188   : > { %v2595_v29 = vpop.f32.mrf.mxu1  ;;  %v3025_v4 = vpop.f32.mrf.mxu0 }
 0x189   : > { %v6682_v46 = vadd.f32 %v5303_v5, %v2775_v52  ;;  %v2774_v48 = vadd.f32 %v2595_v29, %v6547_v20 }
 0x18a   : > { %v5250_v15 = vpop.f32.mrf.mxu1  ;;  %v5306_v43 = vpop.f32.mrf.mxu0 }
 0x18b   : > { %v6685_v41 = vadd.f32 %v3025_v4, %v2774_v48  ;;  %v2777_v0 = vadd.f32 %v5250_v15, %v6556_v19 }
 0x18c   : > { %v2605_v42 = vpop.f32.mrf.mxu1  ;;  %v3035_v55 = vpop.f32.mrf.mxu0 }
 0x18d   : > { %v6688_v7 = vadd.f32 %v5306_v43, %v2777_v0  ;;  %v2776_v28 = vadd.f32 %v2605_v42, %v6561_v36 }
 0x18e   : > { %v5253_v63 = vpop.f32.mrf.mxu1  ;;  %v5309_v9 = vpop.f32.mrf.mxu0 }
 0x18f   : > { %v6691_v47 = vadd.f32 %v3035_v55, %v2776_v28  ;;  %v2779_v8 = vadd.f32 %v5253_v63, %v6570_v27 }
 0x190   : > { %v2615_v53 = vpop.f32.mrf.mxu1  ;;  %v3045_v20 = vpop.f32.mrf.mxu0 }
 0x191   : > { %v6694_v13 = vadd.f32 %v5309_v9, %v2779_v8  ;;  %v2778_v49 = vadd.f32 %v2615_v53, %v6575_v58 }
 0x192   : > { %v5256_v44 = vpop.f32.mrf.mxu1  ;;  %v5312_v19 = vpop.f32.mrf.mxu0 }
 0x193   : > { %v6697_v62 = vadd.f32 %v3045_v20, %v2778_v49  ;;  %v2781_v2 = vadd.f32 %v5256_v44, %v6584_v61 }
 0x194   : > { %v2625_v1 = vpop.f32.mrf.mxu1  ;;  %v3055_v36 = vpop.f32.mrf.mxu0 }
 0x195   : > { %v6700_v21 = vadd.f32 %v5312_v19, %v2781_v2  ;;  %v2780_v59 = vadd.f32 %v2625_v1, %v6589_v54 }
 0x196   : > { %v5259_v32 = vpop.f32.mrf.mxu1  ;;  %v5315_v27 = vpop.f32.mrf.mxu0 }
 0x197   : > { %v6703_v50 = vadd.f32 %v3055_v36, %v2780_v59  ;;  %v2783_v5 = vadd.f32 %v5259_v32, %v6596_v34 }
 0x198   : > { %v2635_v52 = vpop.f32.mrf.mxu1  ;;  %v3065_v58 = vpop.f32.mrf.mxu0 }
 0x199   : > { %v6706_v29 = vadd.f32 %v5315_v27, %v2783_v5  ;;  %v2782_v4 = vadd.f32 %v2635_v52, %v6601_v24 }
 0x19a   : > { %v5262_v48 = vpop.f32.mrf.mxu1  ;;  %v5318_v61 = vpop.f32.mrf.mxu0 }
 0x19b   : > { %v6709_v15 = vadd.f32 %v3065_v58, %v2782_v4  ;;  %v2785_v43 = vadd.f32 %v5262_v48, %v6604_v26 }
 0x19c   : > { %v2645_v0 = vpop.f32.mrf.mxu1  ;;  %v3075_v54 = vpop.f32.mrf.mxu0 }
 0x19d   : > { %v6712_v42 = vadd.f32 %v5318_v61, %v2785_v43  ;;  %v2784_v55 = vadd.f32 %v2645_v0, %v6607_v10 }
 0x19e   : > { %v5265_v28 = vpop.f32.mrf.mxu1  ;;  %v5321_v34 = vpop.f32.mrf.mxu0 }
 0x19f   : > { %v6715_v63 = vadd.f32 %v3075_v54, %v2784_v55  ;;  %v2787_v9 = vadd.f32 %v5265_v28, %v6610_v33 }
 0x1a0   : > { %v2655_v8 = vpop.f32.mrf.mxu1  ;;  %v3085_v24 = vpop.f32.mrf.mxu0 }
 0x1a1   : > { %v6718_v53 = vadd.f32 %v5321_v34, %v2787_v9  ;;  %v2786_v20 = vadd.f32 %v2655_v8, %v6613_v38 }
 0x1a2   : > { %v5268_v49 = vpop.f32.mrf.mxu1  ;;  %v5324_v26 = vpop.f32.mrf.mxu0 }
 0x1a3   : > { %v6721_v44 = vadd.f32 %v3085_v24, %v2786_v20  ;;  %v2789_v19 = vadd.f32 %v5268_v49, %v6616_v39 }
 0x1a4   : > { %v2665_v2 = vpop.f32.mrf.mxu1  ;;  %v3095_v10 = vpop.f32.mrf.mxu0 }
 0x1a5   : > { %v6724_v1 = vadd.f32 %v5324_v26, %v2789_v19  ;;  %v2788_v36 = vadd.f32 %v2665_v2, %v6619_v17 }
 0x1a6   : > { %v5271_v59 = vpop.f32.mrf.mxu1  ;;  %v5327_v33 = vpop.f32.mrf.mxu0 }
 0x1a7   : > { %v6727_v32 = vadd.f32 %v3095_v10, %v2788_v36  ;;  %v2791_v27 = vadd.f32 %v5271_v59, %v6622_v30 }
 0x1a8   : > { %v2675_v5 = vpop.f32.mrf.mxu1  ;;  %v3105_v38 = vpop.f32.mrf.mxu0 }
 0x1a9   : > { %v6730_v52 = vadd.f32 %v5327_v33, %v2791_v27  ;;  %v2790_v58 = vadd.f32 %v2675_v5, %v6625_v18 }
 0x1aa   : > { %v5274_v4 = vpop.f32.mrf.mxu1  ;;  %v5330_v39 = vpop.f32.mrf.mxu0 }
 0x1ab   : > { %v6733_v48 = vadd.f32 %v3105_v38, %v2790_v58  ;;  %v2793_v61 = vadd.f32 %v5274_v4, %v6628_v45 }
 0x1ac   : > { %v2685_v43 = vpop.f32.mrf.mxu1  ;;  %v3115_v17 = vpop.f32.mrf.mxu0 }
 0x1ad   : > { %v6736_v0 = vadd.f32 %v5330_v39, %v2793_v61  ;;  %v2792_v54 = vadd.f32 %v2685_v43, %v6631_v11 }
 0x1ae   : > { %v5277_v55 = vpop.f32.mrf.mxu1  ;;  %v5333_v30 = vpop.f32.mrf.mxu0 }
 0x1af   : > { %v6739_v28 = vadd.f32 %v3115_v17, %v2792_v54  ;;  %v2795_v34 = vadd.f32 %v5277_v55, %v6634_v35 }
 0x1b0   : > { %v2695_v9 = vpop.f32.mrf.mxu1  ;;  %v3125_v18 = vpop.f32.mrf.mxu0 }
 0x1b1   : > { %v6742_v8 = vadd.f32 %v5333_v30, %v2795_v34  ;;  %v2794_v24 = vadd.f32 %v2695_v9, %v6637_v16 }
 0x1b2   : > { %v5280_v20 = vpop.f32.mrf.mxu1  ;;  %v5336_v45 = vpop.f32.mrf.mxu0 }
 0x1b3   : > { %v6745_v49 = vadd.f32 %v3125_v18, %v2794_v24  ;;  %v2797_v26 = vadd.f32 %v5280_v20, %v6640_v12 }
 0x1b4   : > { %v2705_v19 = vpop.f32.mrf.mxu1  ;;  %v3135_v11 = vpop.f32.mrf.mxu0 }
 0x1b5   : > { %v6748_v2 = vadd.f32 %v5336_v45, %v2797_v26  ;;  %v2796_v10 = vadd.f32 %v2705_v19, %v6643_v22 }
 0x1b6   : > { %v5283_v36 = vpop.f32.mrf.mxu1  ;;  %v5339_v35 = vpop.f32.mrf.mxu0 }
 0x1b7   : > { %v6751_v59 = vadd.f32 %v3135_v11, %v2796_v10  ;;  %v2799_v33 = vadd.f32 %v5283_v36, %v6646_v57 }
 0x1b8   : > { %v2715_v27 = vpop.f32.mrf.mxu1  ;;  %v3145_v16 = vpop.f32.mrf.mxu0 }
 0x1b9   : > { %v6754_v5 = vadd.f32 %v5339_v35, %v2799_v33  ;;  %v2798_v38 = vadd.f32 %v2715_v27, %v6649_v6 }
 0x1ba   : > { %v5286_v58 = vpop.f32.mrf.mxu1  ;;  %v5342_v12 = vpop.f32.mrf.mxu0 }
 0x1bb   : > { %v6757_v4 = vadd.f32 %v3145_v16, %v2798_v38  ;;  %v2801_v39 = vadd.f32 %v5286_v58, %v6652_v23 }
 0x1bc   : > { %v2725_v61 = vpop.f32.mrf.mxu1  ;;  %v3155_v22 = vpop.f32.mrf.mxu0 }
 0x1bd   : > { %v6760_v43 = vadd.f32 %v5342_v12, %v2801_v39  ;;  %v2800_v17 = vadd.f32 %v2725_v61, %v6655_v25 }
 0x1be   : > { %v5289_v54 = vpop.f32.mrf.mxu1  ;;  %v5345_v57 = vpop.f32.mrf.mxu0 }
 0x1bf   : > { %v6763_v55 = vadd.f32 %v3155_v22, %v2800_v17  ;;  %v2803_v30 = vadd.f32 %v5289_v54, %v6658_v31 }
 0x1c0   : > { %v2735_v34 = vpop.f32.mrf.mxu1  ;;  %v3165_v6 = vpop.f32.mrf.mxu0 }
 0x1c1   : > { %v6766_v9 = vadd.f32 %v5345_v57, %v2803_v30  ;;  %v2802_v18 = vadd.f32 %v2735_v34, %v6661_v14 }
 0x1c2   : > { %v5292_v24 = vpop.f32.mrf.mxu1  ;;  %v5348_v23 = vpop.f32.mrf.mxu0 }
 0x1c3   : > { %v6769_v20 = vadd.f32 %v3165_v6, %v2802_v18  ;;  %v2805_v45 = vadd.f32 %v5292_v24, %v6664_v56 }
 0x1c4   : > { %v2745_v26 = vpop.f32.mrf.mxu1  ;;  %v3175_v25 = vpop.f32.mrf.mxu0 }
 0x1c5   : > { %v6772_v19 = vadd.f32 %v5348_v23, %v2805_v45  ;;  %v2804_v11 = vadd.f32 %v2745_v26, %v6667_v51 }
 0x1c6   : > { %v5295_v10 = vpop.f32.mrf.mxu1  ;;  %v5351_v31 = vpop.f32.mrf.mxu0 }
 0x1c7   : > { %v6775_v36 = vadd.f32 %v3175_v25, %v2804_v11  ;;  %v2807_v35 = vadd.f32 %v5295_v10, %v6670_v60 }
 0x1c8   : > { %v2755_v14 = vpop.f32.mrf.mxu1  ;;  %v3185_v33 = vpop.f32.mrf.mxu0 }
 0x1c9   : > { %v6778_v27 = vadd.f32 %v5351_v31, %v2807_v35  ;;  %v2806_v16 = vadd.f32 %v2755_v14, %v6673_v3 }
 0x1ca   : > { %v5298_v56 = vpop.f32.mrf.mxu1  ;;  %v5354_v38 = vpop.f32.mrf.mxu0 }
 0x1cb   : > { %v6781_v58 = vadd.f32 %v3185_v33, %v2806_v16  ;;  %v2809_v12 = vadd.f32 %v5298_v56, %v6676_v37 }
 0x1cc   : > { %v2765_v51 = vpop.f32.mrf.mxu1  ;;  %v3195_v39 = vpop.f32.mrf.mxu0 }
 0x1cd   : > { %v6784_v61 = vadd.f32 %v5354_v38, %v2809_v12  ;;  %v2808_v22 = vadd.f32 %v2765_v51, %v6679_v40 }
 0x1ce   : > { %v5359_v17 = vpop.f32.mrf.mxu1  ;;  %v5415_v60 = vpop.f32.mrf.mxu0 }
 0x1cf   : > { %v6788_v54 = vadd.f32 %v3195_v39, %v2808_v22  ;;  %v3635_v57 = vadd.f32 %v5359_v17, %v6682_v46 }
 0x1d0   : > { %v3455_v3 = vpop.f32.mrf.mxu1  ;;  %v3885_v30 = vpop.f32.mrf.mxu0 }
 0x1d1   : > { %v4065_v34 = vadd.f32 %v5415_v60, %v3635_v57  ;;  %v3634_v6 = vadd.f32 %v3455_v3, %v6685_v41 }
 0x1d2   : > { %v5362_v37 = vpop.f32.mrf.mxu1  ;;  %v5418_v40 = vpop.f32.mrf.mxu0 }
 0x1d3   : > { %v4101_v18 = vmax.f32 %v4065_v34, 0.0  ;;  %v4064_v24 = vadd.f32 %v3885_v30, %v3634_v6  ;;  %v3637_v23 = vadd.f32 %v5362_v37, %v6688_v7 }
 0x1d4   : > { %v3465_v46 = vpop.f32.mrf.mxu1  ;;  %v3895_v45 = vpop.f32.mrf.mxu0 }
 0x1d5   : > { %4137 = vst [vmem:[%s6795_s20 + $0x8] sm:$0xff] %v4101_v18  ;;  %v4100_v26 = vmax.f32 %v4064_v24, 0.0  ;;  %v4067_v25 = vadd.f32 %v5418_v40, %v3637_v23  ;;  %v3636_v41 = vadd.f32 %v3465_v46, %v6691_v47 }
 0x1d6   : > { %v5365_v11 = vpop.f32.mrf.mxu1  ;;  %v5421_v10 = vpop.f32.mrf.mxu0 }
 0x1d7   : > { %4136 = vst [vmem:[%s6795_s20] sm:$0xff] %v4100_v26  ;;  %v4103_v31 = vmax.f32 %v4067_v25, 0.0  ;;  %v4066_v35 = vadd.f32 %v3895_v45, %v3636_v41  ;;  %v3639_v14 = vadd.f32 %v5365_v11, %v6694_v13 }
 0x1d8   : > { %v3475_v33 = vpop.f32.mrf.mxu1  ;;  %v3905_v16 = vpop.f32.mrf.mxu0 }
 0x1d9   : > { %4139 = vst [vmem:[%s6795_s20 + $0x18] sm:$0xff] %v4103_v31  ;;  %v4102_v7 = vmax.f32 %v4066_v35, 0.0  ;;  %v4069_v56 = vadd.f32 %v5421_v10, %v3639_v14  ;;  %v3638_v38 = vadd.f32 %v3475_v33, %v6697_v62 }
 0x1da   : > { %v5368_v12 = vpop.f32.mrf.mxu1  ;;  %v5424_v51 = vpop.f32.mrf.mxu0 }
 0x1db   : > { %4138 = vst [vmem:[%s6795_s20 + $0x10] sm:$0xff] %v4102_v7  ;;  %v4105_v47 = vmax.f32 %v4069_v56, 0.0  ;;  %v4068_v39 = vadd.f32 %v3905_v16, %v3638_v38  ;;  %v3641_v22 = vadd.f32 %v5368_v12, %v6700_v21 }
 0x1dc   : > { %v3485_v17 = vpop.f32.mrf.mxu1  ;;  %v3915_v60 = vpop.f32.mrf.mxu0 }
 0x1dd   : > { %4141 = vst [vmem:[%s6795_s20 + $0x28] sm:$0xff] %v4105_v47  ;;  %v4104_v13 = vmax.f32 %v4068_v39, 0.0  ;;  %v4071_v57 = vadd.f32 %v5424_v51, %v3641_v22  ;;  %v3640_v3 = vadd.f32 %v3485_v17, %v6703_v50 }
 0x1de   : > { %v5371_v30 = vpop.f32.mrf.mxu1  ;;  %v5427_v34 = vpop.f32.mrf.mxu0 }
 0x1df   : > { %4140 = vst [vmem:[%s6795_s20 + $0x20] sm:$0xff] %v4104_v13  ;;  %v4107_v62 = vmax.f32 %v4071_v57, 0.0  ;;  %v4070_v6 = vadd.f32 %v3915_v60, %v3640_v3  ;;  %v3643_v37 = vadd.f32 %v5371_v30, %v6706_v29 }
 0x1e0   : > { %v3495_v40 = vpop.f32.mrf.mxu1  ;;  %v3925_v18 = vpop.f32.mrf.mxu0 }
 0x1e1   : > { %4143 = vst [vmem:[%s6795_s20 + $0x38] sm:$0xff] %v4107_v62  ;;  %v4106_v21 = vmax.f32 %v4070_v6, 0.0  ;;  %v4073_v24 = vadd.f32 %v5427_v34, %v3643_v37  ;;  %v3642_v23 = vadd.f32 %v3495_v40, %v6709_v15 }
 0x1e2   : > { %v5374_v46 = vpop.f32.mrf.mxu1  ;;  %v5430_v45 = vpop.f32.mrf.mxu0 }
 0x1e3   : > { %4142 = vst [vmem:[%s6795_s20 + $0x30] sm:$0xff] %v4106_v21  ;;  %v4109_v50 = vmax.f32 %v4073_v24, 0.0  ;;  %v4072_v26 = vadd.f32 %v3925_v18, %v3642_v23  ;;  %v3645_v25 = vadd.f32 %v5374_v46, %v6712_v42 }
 0x1e4   : > { %v3505_v41 = vpop.f32.mrf.mxu1  ;;  %v3935_v11 = vpop.f32.mrf.mxu0 }
 0x1e5   : > { %4145 = vst [vmem:[%s6795_s20 + $0x48] sm:$0xff] %v4109_v50  ;;  %v4108_v29 = vmax.f32 %v4072_v26, 0.0  ;;  %v4075_v10 = vadd.f32 %v5430_v45, %v3645_v25  ;;  %v3644_v31 = vadd.f32 %v3505_v41, %v6715_v63 }
 0x1e6   : > { %v5377_v35 = vpop.f32.mrf.mxu1  ;;  %v5433_v14 = vpop.f32.mrf.mxu0 }
 0x1e7   : > { %4144 = vst [vmem:[%s6795_s20 + $0x40] sm:$0xff] %v4108_v29  ;;  %v4111_v15 = vmax.f32 %v4075_v10, 0.0  ;;  %v4074_v33 = vadd.f32 %v3935_v11, %v3644_v31  ;;  %v3647_v16 = vadd.f32 %v5377_v35, %v6718_v53 }
 0x1e8   : > { %v3515_v7 = vpop.f32.mrf.mxu1  ;;  %v3945_v56 = vpop.f32.mrf.mxu0 }
 0x1e9   : > { %4147 = vst [vmem:[%s6795_s20 + $0x58] sm:$0xff] %v4111_v15  ;;  %v4110_v42 = vmax.f32 %v4074_v33, 0.0  ;;  %v4077_v38 = vadd.f32 %v5433_v14, %v3647_v16  ;;  %v3646_v12 = vadd.f32 %v3515_v7, %v6721_v44 }
 0x1ea   : > { %v5380_v51 = vpop.f32.mrf.mxu1  ;;  %v5436_v47 = vpop.f32.mrf.mxu0 }
 0x1eb   : > { %4146 = vst [vmem:[%s6795_s20 + $0x50] sm:$0xff] %v4110_v42  ;;  %v4113_v63 = vmax.f32 %v4077_v38, 0.0  ;;  %v4076_v39 = vadd.f32 %v3945_v56, %v3646_v12  ;;  %v3649_v22 = vadd.f32 %v5380_v51, %v6724_v1 }
 0x1ec   : > { %v3525_v17 = vpop.f32.mrf.mxu1  ;;  %v3955_v60 = vpop.f32.mrf.mxu0 }
 0x1ed   : > { %4149 = vst [vmem:[%s6795_s20 + $0x68] sm:$0xff] %v4113_v63  ;;  %v4112_v53 = vmax.f32 %v4076_v39, 0.0  ;;  %v4079_v13 = vadd.f32 %v5436_v47, %v3649_v22  ;;  %v3648_v57 = vadd.f32 %v3525_v17, %v6727_v32 }
 0x1ee   : > { %v5383_v3 = vpop.f32.mrf.mxu1  ;;  %v5439_v30 = vpop.f32.mrf.mxu0 }
 0x1ef   : > { %4148 = vst [vmem:[%s6795_s20 + $0x60] sm:$0xff] %v4112_v53  ;;  %v4115_v44 = vmax.f32 %v4079_v13, 0.0  ;;  %v4078_v34 = vadd.f32 %v3955_v60, %v3648_v57  ;;  %v3651_v62 = vadd.f32 %v5383_v3, %v6730_v52 }
 0x1f0   : > { %v3535_v6 = vpop.f32.mrf.mxu1  ;;  %v3965_v37 = vpop.f32.mrf.mxu0 }
 0x1f1   : > { %4151 = vst [vmem:[%s6795_s20 + $0x78] sm:$0xff] %v4115_v44  ;;  %v4114_v1 = vmax.f32 %v4078_v34, 0.0  ;;  %v4081_v40 = vadd.f32 %v5439_v30, %v3651_v62  ;;  %v3650_v18 = vadd.f32 %v3535_v6, %v6733_v48 }
 0x1f2   : > { %v5386_v21 = vpop.f32.mrf.mxu1  ;;  %v5442_v24 = vpop.f32.mrf.mxu0 }
 0x1f3   : > { %4150 = vst [vmem:[%s6795_s20 + $0x70] sm:$0xff] %v4114_v1  ;;  %v4117_v32 = vmax.f32 %v4081_v40, 0.0  ;;  %v4080_v23 = vadd.f32 %v3965_v37, %v3650_v18  ;;  %v3653_v46 = vadd.f32 %v5386_v21, %v6736_v0 }
 0x1f4   : > { %v3545_v45 = vpop.f32.mrf.mxu1  ;;  %v3975_v50 = vpop.f32.mrf.mxu0 }
 0x1f5   : > { %4153 = vst [vmem:[%s6795_s20 + $0x88] sm:$0xff] %v4117_v32  ;;  %v4116_v52 = vmax.f32 %v4080_v23, 0.0  ;;  %v4083_v26 = vadd.f32 %v5442_v24, %v3653_v46  ;;  %v3652_v25 = vadd.f32 %v3545_v45, %v6739_v28 }
 0x1f6   : > { %v5389_v41 = vpop.f32.mrf.mxu1  ;;  %v5445_v11 = vpop.f32.mrf.mxu0 }
 0x1f7   : > { %4152 = vst [vmem:[%s6795_s20 + $0x80] sm:$0xff] %v4116_v52  ;;  %v4119_v48 = vmax.f32 %v4083_v26, 0.0  ;;  %v4082_v29 = vadd.f32 %v3975_v50, %v3652_v25  ;;  %v3655_v10 = vadd.f32 %v5389_v41, %v6742_v8 }
 0x1f8   : > { %v3555_v31 = vpop.f32.mrf.mxu1  ;;  %v3985_v35 = vpop.f32.mrf.mxu0 }
 0x1f9   : > { %4155 = vst [vmem:[%s6795_s20 + $0x98] sm:$0xff] %v4119_v48  ;;  %v4118_v0 = vmax.f32 %v4082_v29, 0.0  ;;  %v4085_v14 = vadd.f32 %v5445_v11, %v3655_v10  ;;  %v3654_v15 = vadd.f32 %v3555_v31, %v6745_v49 }
 0x1fa   : > { %v5392_v33 = vpop.f32.mrf.mxu1  ;;  %v5448_v16 = vpop.f32.mrf.mxu0 }
 0x1fb   : > { %4154 = vst [vmem:[%s6795_s20 + $0x90] sm:$0xff] %v4118_v0  ;;  %v4121_v28 = vmax.f32 %v4085_v14, 0.0  ;;  %v4084_v7 = vadd.f32 %v3985_v35, %v3654_v15  ;;  %v3657_v56 = vadd.f32 %v5392_v33, %v6748_v2 }
 0x1fc   : > { %v3565_v42 = vpop.f32.mrf.mxu1  ;;  %v3995_v38 = vpop.f32.mrf.mxu0 }
 0x1fd   : > { %4157 = vst [vmem:[%s6795_s20 + $0xa8] sm:$0xff] %v4121_v28  ;;  %v4120_v8 = vmax.f32 %v4084_v7, 0.0  ;;  %v4087_v12 = vadd.f32 %v5448_v16, %v3657_v56  ;;  %v3656_v51 = vadd.f32 %v3565_v42, %v6751_v59 }
 0x1fe   : > { %v5395_v47 = vpop.f32.mrf.mxu1  ;;  %v5451_v63 = vpop.f32.mrf.mxu0 }
 0x1ff   : > { %4156 = vst [vmem:[%s6795_s20 + $0xa0] sm:$0xff] %v4120_v8  ;;  %v4123_v49 = vmax.f32 %v4087_v12, 0.0  ;;  %v4086_v39 = vadd.f32 %v3995_v38, %v3656_v51  ;;  %v3659_v22 = vadd.f32 %v5395_v47, %v6754_v5 }
 0x200   : > { %v3575_v17 = vpop.f32.mrf.mxu1  ;;  %v4005_v60 = vpop.f32.mrf.mxu0 }
 0x201   : > { %4159 = vst [vmem:[%s6795_s20 + $0xb8] sm:$0xff] %v4123_v49  ;;  %v4122_v2 = vmax.f32 %v4086_v39, 0.0  ;;  %v4089_v53 = vadd.f32 %v5451_v63, %v3659_v22  ;;  %v3658_v13 = vadd.f32 %v3575_v17, %v6757_v4 }
 0x202   : > { %v5398_v57 = vpop.f32.mrf.mxu1  ;;  %v5454_v3 = vpop.f32.mrf.mxu0 }
 0x203   : > { %4158 = vst [vmem:[%s6795_s20 + $0xb0] sm:$0xff] %v4122_v2  ;;  %v4125_v59 = vmax.f32 %v4089_v53, 0.0  ;;  %v4088_v30 = vadd.f32 %v4005_v60, %v3658_v13  ;;  %v3661_v44 = vadd.f32 %v5398_v57, %v6760_v43 }
 0x204   : > { %v3585_v34 = vpop.f32.mrf.mxu1  ;;  %v4015_v62 = vpop.f32.mrf.mxu0 }
 0x205   : > { %4161 = vst [vmem:[%s6795_s20 + $0xc8] sm:$0xff] %v4125_v59  ;;  %v4124_v5 = vmax.f32 %v4088_v30, 0.0  ;;  %v4091_v6 = vadd.f32 %v5454_v3, %v3661_v44  ;;  %v3660_v37 = vadd.f32 %v3585_v34, %v6763_v55 }
 0x206   : > { %v5401_v1 = vpop.f32.mrf.mxu1  ;;  %v5457_v40 = vpop.f32.mrf.mxu0 }
 0x207   : > { %4160 = vst [vmem:[%s6795_s20 + $0xc0] sm:$0xff] %v4124_v5  ;;  %v4127_v4 = vmax.f32 %v4091_v6, 0.0  ;;  %v4090_v18 = vadd.f32 %v4015_v62, %v3660_v37  ;;  %v3663_v21 = vadd.f32 %v5401_v1, %v6766_v9 }
 0x208   : > { %v3595_v24 = vpop.f32.mrf.mxu1  ;;  %v4025_v32 = vpop.f32.mrf.mxu0 }
 0x209   : > { %4163 = vst [vmem:[%s6795_s20 + $0xd8] sm:$0xff] %v4127_v4  ;;  %v4126_v43 = vmax.f32 %v4090_v18, 0.0  ;;  %v4093_v23 = vadd.f32 %v5457_v40, %v3663_v21  ;;  %v3662_v46 = vadd.f32 %v3595_v24, %v6769_v20 }
 0x20a   : > { %v5404_v45 = vpop.f32.mrf.mxu1  ;;  %v5460_v50 = vpop.f32.mrf.mxu0 }
 0x20b   : > { %4162 = vst [vmem:[%s6795_s20 + $0xd0] sm:$0xff] %v4126_v43  ;;  %v4129_v55 = vmax.f32 %v4093_v23, 0.0  ;;  %v4092_v52 = vadd.f32 %v4025_v32, %v3662_v46  ;;  %v3665_v26 = vadd.f32 %v5404_v45, %v6772_v19 }
 0x20c   : > { %v3605_v25 = vpop.f32.mrf.mxu1  ;;  %v4035_v41 = vpop.f32.mrf.mxu0 }
 0x20d   : > { %4165 = vst [vmem:[%s6795_s20 + $0xe8] sm:$0xff] %v4129_v55  ;;  %v4128_v9 = vmax.f32 %v4092_v52, 0.0  ;;  %v4095_v11 = vadd.f32 %v5460_v50, %v3665_v26  ;;  %v3664_v48 = vadd.f32 %v3605_v25, %v6775_v36 }
 0x20e   : > { %v5407_v29 = vpop.f32.mrf.mxu1  ;;  %v5463_v10 = vpop.f32.mrf.mxu0 }
 0x20f   : > { %4164 = vst [vmem:[%s6795_s20 + $0xe0] sm:$0xff] %v4128_v9  ;;  %v4131_v20 = vmax.f32 %v4095_v11, 0.0  ;;  %v4094_v31 = vadd.f32 %v4035_v41, %v3664_v48  ;;  %v3667_v35 = vadd.f32 %v5407_v29, %v6778_v27 }
 0x210   : > { %v3615_v0 = vpop.f32.mrf.mxu1  ;;  %v4045_v14 = vpop.f32.mrf.mxu0 }
 0x211   : > { %4167 = vst [vmem:[%s6795_s20 + $0xf8] sm:$0xff] %v4131_v20  ;;  %v4130_v19 = vmax.f32 %v4094_v31, 0.0  ;;  %v4097_v15 = vadd.f32 %v5463_v10, %v3667_v35  ;;  %v3666_v33 = vadd.f32 %v3615_v0, %v6781_v58 }
 0x212   : > { %v5410_v16 = vpop.f32.mrf.mxu1  ;;  %v5466_v28 = vpop.f32.mrf.mxu0 }
 0x213   : > { %4166 = vst [vmem:[%s6795_s20 + $0xf0] sm:$0xff] %v4130_v19  ;;  %v4133_v36 = vmax.f32 %v4097_v15, 0.0  ;;  %v4096_v7 = vadd.f32 %v4045_v14, %v3666_v33  ;;  %v3669_v56 = vadd.f32 %v5410_v16, %v6784_v61 }
 0x214   : > { %v3625_v42 = vpop.f32.mrf.mxu1  ;;  %v4055_v12 = vpop.f32.mrf.mxu0 }
 0x215   : > { %4169 = vst [vmem:[%s6795_s20 + $0x108] sm:$0xff] %v4133_v36  ;;  %v4132_v27 = vmax.f32 %v4096_v7, 0.0  ;;  %v4099_v38 = vadd.f32 %v5466_v28, %v3669_v56  ;;  %v3668_v8 = vadd.f32 %v3625_v42, %v6788_v54 }
 0x217   : > { %4168 = vst [vmem:[%s6795_s20 + $0x100] sm:$0xff] %v4132_v27  ;;  %v4135_v51 = vmax.f32 %v4099_v38, 0.0  ;;  %v4098_v47 = vadd.f32 %v4055_v12, %v3668_v8 }
 0x219   : > { %4171 = vst [vmem:[%s6795_s20 + $0x118] sm:$0xff] %v4135_v51  ;;  %v4134_v58 = vmax.f32 %v4098_v47, 0.0 }
 0x21b   : > { %4170 = vst [vmem:[%s6795_s20 + $0x110] sm:$0xff] %v4134_v58 }
 0x21c PF: > { %s13_s14 = sadd.s32 1, %s5517_s14   ;;  %s6880_s12 = smov %s5513_s13 }
 0x21d   : > { %p10_p5 = scmp.ge.s32.totalorder %s13_s14, 4   ;;  %s6881_s13 = smov %s6883_s15 }
 0x21f   :  { %12 = sbr.rel (!%p10_p5) target bundleno = 2 (0x2), region = 76 }

</bundles_post_ra>
